<compile_context>
chip_gen: v7x
topology: tpu7x:2x2x1
jax: 0.10.0
libtpu: 0.0.40
codegen_flags: <defaults>
</compile_context>

<pallas_src>
import jax
import jax.numpy as jnp
from jax.experimental import pallas as pl
from jax.experimental.pallas import tpu as pltpu

_LANE = 128
_SUBLANE = 8


def _round_up(x, m):
    return (x + m - 1) // m * m


def _choose_batch_tile(batch):
    """~256-row tiles: near HBM roofline, VMEM/vreg friendly, and (when the
    batch allows) >= 2 grid steps so both v7x TensorCores get work."""
    half = _round_up(max(-(-batch // 2), 1), _SUBLANE)
    return int(min(256, half))


def _mlp_kernel(x_ref,
                w0_ref, b0_ref,
                w1_ref, b1_ref,
                w2_ref, b2_ref,
                w3_ref, b3_ref,
                o_ref):
    """All four layers for one batch tile, fused in VMEM.

    MXU inputs use the (bfloat16) weight dtype; accumulation is float32.
    """
    cd = w0_ref.dtype
    x = x_ref[...].astype(cd)

    # Linear(clip_dim -> hidden); no activation after it (per nn.Sequential).
    h = jnp.dot(x, w0_ref[...], preferred_element_type=jnp.float32) + b0_ref[...]

    # Hidden block 1: Linear + ReLU (+ dropout == identity in eval mode).
    h = jnp.dot(h.astype(cd), w1_ref[...],
                preferred_element_type=jnp.float32) + b1_ref[...]
    h = jnp.maximum(h, 0.0)

    # Hidden block 2: Linear + ReLU (+ dropout == identity in eval mode).
    h = jnp.dot(h.astype(cd), w2_ref[...],
                preferred_element_type=jnp.float32) + b2_ref[...]
    h = jnp.maximum(h, 0.0)

    # Linear(hidden -> latent_dim)
    out = jnp.dot(h.astype(cd), w3_ref[...],
                  preferred_element_type=jnp.float32) + b3_ref[...]
    o_ref[...] = out.astype(o_ref.dtype)


def init_params(key, clip_dim, hidden_dim, latent_dim):
    """Deterministic init mimicking nn.Linear default (uniform +-1/sqrt(fan_in)).

    Weights are (in, out); biases are (1, out). Stored in float32."""
    dims = [(clip_dim, hidden_dim),
            (hidden_dim, hidden_dim),
            (hidden_dim, hidden_dim),
            (hidden_dim, latent_dim)]
    params = {}
    keys = jax.random.split(key, 2 * len(dims))
    for idx, (fan_in, fan_out) in enumerate(dims):
        bound = 1.0 / (fan_in ** 0.5)
        w = jax.random.uniform(keys[2 * idx], (fan_in, fan_out),
                               minval=-bound, maxval=bound, dtype=jnp.float32)
        b = jax.random.uniform(keys[2 * idx + 1], (1, fan_out),
                               minval=-bound, maxval=bound, dtype=jnp.float32)
        params[f"w{idx}"] = w
        params[f"b{idx}"] = b
    return params


def prepare_params(params_f32, compute_dtype=jnp.bfloat16):
    """One-time prep: zero-pad feature dims to multiples of 128 lanes and cast
    weights to the MXU compute dtype (biases stay f32: they are added after the
    f32 accumulation)."""
    prepared = {}
    for idx in range(4):
        w = params_f32[f"w{idx}"]
        b = params_f32[f"b{idx}"]
        fin, fout = w.shape
        pin, pout = _round_up(fin, _LANE), _round_up(fout, _LANE)
        if (pin, pout) != (fin, fout):
            w = jnp.pad(w, ((0, pin - fin), (0, pout - fout)))
            b = jnp.pad(b, ((0, 0), (0, pout - fout)))
        prepared[f"w{idx}"] = w.astype(compute_dtype)
        prepared[f"b{idx}"] = b.astype(jnp.float32)
    return prepared


def mapping_clip_to_latent(clip, params, *, latent_dim=None, batch_tile=None,
                           out_dtype=None):
    """Forward pass of MappingCLIPToLatent.

    clip:   (B, clip_dim) array (any float dtype; cast to compute dtype in-kernel)
    params: output of prepare_params (padded, weights in bf16, biases f32)
    latent_dim: unpadded output width to return (defaults to padded width)
    """
    B, clip_dim = clip.shape
    pad_clip = params["w0"].shape[0]
    hidden = params["w0"].shape[1]
    pad_latent = params["w3"].shape[1]
    if latent_dim is None:
        latent_dim = pad_latent
    if out_dtype is None:
        out_dtype = clip.dtype

    if batch_tile is None:
        batch_tile = _choose_batch_tile(B)
    batch_tile = max(_round_up(batch_tile, _SUBLANE), _SUBLANE)
    Bp = _round_up(B, batch_tile)

    x = clip
    if Bp != B or pad_clip != clip_dim:
        x = jnp.pad(x, ((0, Bp - B), (0, pad_clip - clip_dim)))

    grid = (Bp // batch_tile,)

    def x_map(i):
        return (i, 0)

    def const_map(i):
        return (0, 0)

    ordered_names = ["w0", "b0", "w1", "b1", "w2", "b2", "w3", "b3"]
    weight_specs = [pl.BlockSpec(params[n].shape, const_map) for n in ordered_names]

    itemsize = lambda dt: jnp.dtype(dt).itemsize
    weight_bytes = sum(int(params[n].size) * itemsize(params[n].dtype)
                       for n in ordered_names)
    # Resident footprint: weights (double-buffered by default), 2x input tile,
    # 2x output tile, f32 intermediates, plus headroom. Clamp to v7x's 64 MiB.
    io_bytes = 2 * batch_tile * (pad_clip * itemsize(x.dtype)
                                 + pad_latent * itemsize(out_dtype))
    work_bytes = 6 * batch_tile * max(hidden, pad_latent) * 4
    vmem_limit = int(min(2 * weight_bytes + io_bytes + work_bytes + (8 << 20),
                         64 << 20))
    vmem_limit = max(vmem_limit, 16 << 20)

    flops = 2 * Bp * (pad_clip * hidden + 2 * hidden * hidden + hidden * pad_latent)
    bytes_accessed = (Bp * pad_clip * itemsize(x.dtype)
                      + weight_bytes
                      + Bp * pad_latent * itemsize(out_dtype))
    cost = pl.CostEstimate(flops=int(flops), transcendentals=0,
                           bytes_accessed=int(bytes_accessed))

    out = pl.pallas_call(
        _mlp_kernel,
        out_shape=jax.ShapeDtypeStruct((Bp, pad_latent), out_dtype),
        grid_spec=pltpu.PrefetchScalarGridSpec(
            num_scalar_prefetch=0,
            grid=grid,
            in_specs=[pl.BlockSpec((batch_tile, pad_clip), x_map)] + weight_specs,
            out_specs=pl.BlockSpec((batch_tile, pad_latent), x_map),
        ),
        compiler_params=pltpu.CompilerParams(
            dimension_semantics=("parallel",),
            vmem_limit_bytes=vmem_limit),
        cost_estimate=cost,
    )(x,
      params["w0"], params["b0"],
      params["w1"], params["b1"],
      params["w2"], params["b2"],
      params["w3"], params["b3"])

    if Bp != B or pad_latent != latent_dim:
        out = out[:B, :latent_dim]
    return out


def _reference_forward(clip, params, latent_dim=None):
    """Pure-JAX mirror of the kernel math (same bf16 inputs, f32 accumulation)."""
    cd = params["w0"].dtype
    pad_in = params["w0"].shape[0]
    _, c = clip.shape
    x = clip
    if pad_in != c:
        x = jnp.pad(x, ((0, 0), (0, pad_in - c)))
    x = x.astype(cd)
    h = jnp.dot(x, params["w0"], preferred_element_type=jnp.float32) + params["b0"]
    h = jnp.maximum(jnp.dot(h.astype(cd), params["w1"],
                            preferred_element_type=jnp.float32) + params["b1"], 0.0)
    h = jnp.maximum(jnp.dot(h.astype(cd), params["w2"],
                            preferred_element_type=jnp.float32) + params["b2"], 0.0)
    out = jnp.dot(h.astype(cd), params["w3"],
                  preferred_element_type=jnp.float32) + params["b3"]
    if latent_dim is not None:
        out = out[:, :latent_dim]
    return out.astype(clip.dtype)


if __name__ == "__main__":
    key = jax.random.PRNGKey(0)
    k_x, k_p, k_x2, k_p2 = jax.random.split(key, 4)

    # Small, 128-aligned shapes consistent with the module (clip -> latent MLP).
    B, CLIP_DIM, HIDDEN_DIM, LATENT_DIM = 1024, 128, 128, 256
    clip = jax.random.normal(k_x, (B, CLIP_DIM), dtype=jnp.float32)
    params = prepare_params(init_params(k_p, CLIP_DIM, HIDDEN_DIM, LATENT_DIM))

    out = mapping_clip_to_latent(clip, params, latent_dim=LATENT_DIM)
    out = jax.block_until_ready(out)
    ref = _reference_forward(clip, params, LATENT_DIM)
    assert out.shape == (B, LATENT_DIM)
    assert jnp.allclose(out, ref, atol=1e-2, rtol=1e-2), \
        float(jnp.max(jnp.abs(out - ref)))

    # Unaligned shapes exercise wrapper-side padding (batch, clip_dim, latent_dim).
    B2, C2, H2, L2 = 100, 96, 64, 200
    clip2 = jax.random.normal(k_x2, (B2, C2), dtype=jnp.float32)
    params2 = prepare_params(init_params(k_p2, C2, H2, L2))
    out2 = jax.block_until_ready(
        mapping_clip_to_latent(clip2, params2, latent_dim=L2))
    ref2 = _reference_forward(clip2, params2, L2)
    assert out2.shape == (B2, L2)
    assert jnp.allclose(out2, ref2, atol=1e-2, rtol=1e-2)

    print("KERNEL_OK")
</pallas_src>

<mosaic_0001>
module attributes {stable_mosaic.version = 11 : i64} {
  func.func @_mlp_kernel(%arg0: i32, %arg1: memref<256x128xf32, #tpu.memory_space<vmem>>, %arg2: memref<128x128xbf16, #tpu.memory_space<vmem>>, %arg3: memref<1x128xf32, #tpu.memory_space<vmem>>, %arg4: memref<128x128xbf16, #tpu.memory_space<vmem>>, %arg5: memref<1x128xf32, #tpu.memory_space<vmem>>, %arg6: memref<128x128xbf16, #tpu.memory_space<vmem>>, %arg7: memref<1x128xf32, #tpu.memory_space<vmem>>, %arg8: memref<128x256xbf16, #tpu.memory_space<vmem>>, %arg9: memref<1x256xf32, #tpu.memory_space<vmem>>, %arg10: memref<256x256xf32, #tpu.memory_space<vmem>>) attributes {dimension_semantics = [#tpu.dimension_semantics<parallel>], iteration_bounds = array<i64: 4>, scalar_prefetch = 0 : i64, scratch_operands = 0 : i64, tpu.core_type = #tpu.core_type<tc>, window_params = [{transform_indices = @transform_0, window_bounds = array<i64: 256, 128>}, {pipeline_mode = #tpu.pipeline_mode<synchronous>, transform_indices = @transform_1, window_bounds = array<i64: 128, 128>}, {pipeline_mode = #tpu.pipeline_mode<synchronous>, transform_indices = @transform_2, window_bounds = array<i64: 1, 128>}, {pipeline_mode = #tpu.pipeline_mode<synchronous>, transform_indices = @transform_3, window_bounds = array<i64: 128, 128>}, {pipeline_mode = #tpu.pipeline_mode<synchronous>, transform_indices = @transform_4, window_bounds = array<i64: 1, 128>}, {pipeline_mode = #tpu.pipeline_mode<synchronous>, transform_indices = @transform_5, window_bounds = array<i64: 128, 128>}, {pipeline_mode = #tpu.pipeline_mode<synchronous>, transform_indices = @transform_6, window_bounds = array<i64: 1, 128>}, {pipeline_mode = #tpu.pipeline_mode<synchronous>, transform_indices = @transform_7, window_bounds = array<i64: 128, 256>}, {pipeline_mode = #tpu.pipeline_mode<synchronous>, transform_indices = @transform_8, window_bounds = array<i64: 1, 256>}, {transform_indices = @transform_9, window_bounds = array<i64: 256, 256>}]} {
    %c0 = arith.constant 0 : index
    %c0_0 = arith.constant 0 : index
    %0 = vector.load %arg1[%c0, %c0_0] : memref<256x128xf32, #tpu.memory_space<vmem>>, vector<256x128xf32>
    %1 = arith.truncf %0 : vector<256x128xf32> to vector<256x128xbf16>
    %c0_1 = arith.constant 0 : index
    %c0_2 = arith.constant 0 : index
    %2 = vector.load %arg2[%c0_1, %c0_2] : memref<128x128xbf16, #tpu.memory_space<vmem>>, vector<128x128xbf16>
    %cst = arith.constant dense<0.000000e+00> : vector<256x128xf32>
    %3 = tpu.matmul %1, %2, %cst {dimension_numbers = #tpu.dot_dimension_numbers<[1], [0], [0], [1], [0, 0, 1, 1], [], []>} : vector<256x128xbf16>, vector<128x128xbf16>, vector<256x128xf32> -> vector<256x128xf32>
    %c0_3 = arith.constant 0 : index
    %c0_4 = arith.constant 0 : index
    %4 = vector.load %arg3[%c0_3, %c0_4] : memref<1x128xf32, #tpu.memory_space<vmem>>, vector<1x128xf32>
    %5 = vector.broadcast %4 : vector<1x128xf32> to vector<256x128xf32>
    %6 = arith.addf %3, %5 : vector<256x128xf32>
    %7 = arith.truncf %6 : vector<256x128xf32> to vector<256x128xbf16>
    %c0_5 = arith.constant 0 : index
    %c0_6 = arith.constant 0 : index
    %8 = vector.load %arg4[%c0_5, %c0_6] : memref<128x128xbf16, #tpu.memory_space<vmem>>, vector<128x128xbf16>
    %cst_7 = arith.constant dense<0.000000e+00> : vector<256x128xf32>
    %9 = tpu.matmul %7, %8, %cst_7 {dimension_numbers = #tpu.dot_dimension_numbers<[1], [0], [0], [1], [0, 0, 1, 1], [], []>} : vector<256x128xbf16>, vector<128x128xbf16>, vector<256x128xf32> -> vector<256x128xf32>
    %c0_8 = arith.constant 0 : index
    %c0_9 = arith.constant 0 : index
    %10 = vector.load %arg5[%c0_8, %c0_9] : memref<1x128xf32, #tpu.memory_space<vmem>>, vector<1x128xf32>
    %11 = vector.broadcast %10 : vector<1x128xf32> to vector<256x128xf32>
    %12 = arith.addf %9, %11 : vector<256x128xf32>
    %cst_10 = arith.constant 0.000000e+00 : f32
    %13 = vector.broadcast %cst_10 : f32 to vector<256x128xf32>
    %14 = arith.maximumf %12, %13 : vector<256x128xf32>
    %15 = arith.truncf %14 : vector<256x128xf32> to vector<256x128xbf16>
    %c0_11 = arith.constant 0 : index
    %c0_12 = arith.constant 0 : index
    %16 = vector.load %arg6[%c0_11, %c0_12] : memref<128x128xbf16, #tpu.memory_space<vmem>>, vector<128x128xbf16>
    %cst_13 = arith.constant dense<0.000000e+00> : vector<256x128xf32>
    %17 = tpu.matmul %15, %16, %cst_13 {dimension_numbers = #tpu.dot_dimension_numbers<[1], [0], [0], [1], [0, 0, 1, 1], [], []>} : vector<256x128xbf16>, vector<128x128xbf16>, vector<256x128xf32> -> vector<256x128xf32>
    %c0_14 = arith.constant 0 : index
    %c0_15 = arith.constant 0 : index
    %18 = vector.load %arg7[%c0_14, %c0_15] : memref<1x128xf32, #tpu.memory_space<vmem>>, vector<1x128xf32>
    %19 = vector.broadcast %18 : vector<1x128xf32> to vector<256x128xf32>
    %20 = arith.addf %17, %19 : vector<256x128xf32>
    %cst_16 = arith.constant 0.000000e+00 : f32
    %21 = vector.broadcast %cst_16 : f32 to vector<256x128xf32>
    %22 = arith.maximumf %20, %21 : vector<256x128xf32>
    %23 = arith.truncf %22 : vector<256x128xf32> to vector<256x128xbf16>
    %c0_17 = arith.constant 0 : index
    %c0_18 = arith.constant 0 : index
    %24 = vector.load %arg8[%c0_17, %c0_18] : memref<128x256xbf16, #tpu.memory_space<vmem>>, vector<128x256xbf16>
    %cst_19 = arith.constant dense<0.000000e+00> : vector<256x256xf32>
    %25 = tpu.matmul %23, %24, %cst_19 {dimension_numbers = #tpu.dot_dimension_numbers<[1], [0], [0], [1], [0, 0, 1, 1], [], []>} : vector<256x128xbf16>, vector<128x256xbf16>, vector<256x256xf32> -> vector<256x256xf32>
    %c0_20 = arith.constant 0 : index
    %c0_21 = arith.constant 0 : index
    %26 = vector.load %arg9[%c0_20, %c0_21] : memref<1x256xf32, #tpu.memory_space<vmem>>, vector<1x256xf32>
    %27 = vector.broadcast %26 : vector<1x256xf32> to vector<256x256xf32>
    %28 = arith.addf %25, %27 : vector<256x256xf32>
    %c0_22 = arith.constant 0 : index
    %c0_23 = arith.constant 0 : index
    %29 = vector.load %arg10[%c0_22, %c0_23] : memref<256x256xf32, #tpu.memory_space<vmem>>, vector<256x256xf32>
    tpu.vector_store %arg10[%c0_22, %c0_23], %28 {strides = array<i32>} : memref<256x256xf32, #tpu.memory_space<vmem>>, vector<256x256xf32>,
    return
  }
  func.func @transform_0(%arg0: i32) -> (i32, i32) {
    %c0_i32 = arith.constant 0 : i32
    %c0_i32_0 = arith.constant 0 : i32
    return %arg0, %c0_i32 : i32, i32
  }
  func.func @transform_1(%arg0: i32) -> (i32, i32) {
    %c0_i32 = arith.constant 0 : i32
    %c0_i32_0 = arith.constant 0 : i32
    %c0_i32_1 = arith.constant 0 : i32
    return %c0_i32, %c0_i32_0 : i32, i32
  }
  func.func @transform_2(%arg0: i32) -> (i32, i32) {
    %c0_i32 = arith.constant 0 : i32
    %c0_i32_0 = arith.constant 0 : i32
    %c0_i32_1 = arith.constant 0 : i32
    return %c0_i32, %c0_i32_0 : i32, i32
  }
  func.func @transform_3(%arg0: i32) -> (i32, i32) {
    %c0_i32 = arith.constant 0 : i32
    %c0_i32_0 = arith.constant 0 : i32
    %c0_i32_1 = arith.constant 0 : i32
    return %c0_i32, %c0_i32_0 : i32, i32
  }
  func.func @transform_4(%arg0: i32) -> (i32, i32) {
    %c0_i32 = arith.constant 0 : i32
    %c0_i32_0 = arith.constant 0 : i32
    %c0_i32_1 = arith.constant 0 : i32
    return %c0_i32, %c0_i32_0 : i32, i32
  }
  func.func @transform_5(%arg0: i32) -> (i32, i32) {
    %c0_i32 = arith.constant 0 : i32
    %c0_i32_0 = arith.constant 0 : i32
    %c0_i32_1 = arith.constant 0 : i32
    return %c0_i32, %c0_i32_0 : i32, i32
  }
  func.func @transform_6(%arg0: i32) -> (i32, i32) {
    %c0_i32 = arith.constant 0 : i32
    %c0_i32_0 = arith.constant 0 : i32
    %c0_i32_1 = arith.constant 0 : i32
    return %c0_i32, %c0_i32_0 : i32, i32
  }
  func.func @transform_7(%arg0: i32) -> (i32, i32) {
    %c0_i32 = arith.constant 0 : i32
    %c0_i32_0 = arith.constant 0 : i32
    %c0_i32_1 = arith.constant 0 : i32
    return %c0_i32, %c0_i32_0 : i32, i32
  }
  func.func @transform_8(%arg0: i32) -> (i32, i32) {
    %c0_i32 = arith.constant 0 : i32
    %c0_i32_0 = arith.constant 0 : i32
    %c0_i32_1 = arith.constant 0 : i32
    return %c0_i32, %c0_i32_0 : i32, i32
  }
  func.func @transform_9(%arg0: i32) -> (i32, i32) {
    %c0_i32 = arith.constant 0 : i32
    %c0_i32_0 = arith.constant 0 : i32
    return %arg0, %c0_i32 : i32, i32
  }
}

</mosaic_0001>

<bundles_post_ra>
// kernel: tpu_custom_call.1
= control target key start
LH: loop header
LB: loop body
LE: loop exit
PB: predicated region body
PF: predicated region fallthrough
CT: control target
= control target key end

     0   :  { %s3076_s0 = inlined_call_operand.hbm [shape: f32[1024,128], index: 0, kind: input, shape index: {}]   ;;  %s3077_s1 = inlined_call_operand.hbm [shape: bf16[128,128], index: 1, kind: input, shape index: {}]   ;;  %s3078_s2 = inlined_call_operand.vmem [shape: f32[1,128], index: 2, kind: input, shape index: {}]   ;;  %s3079_s3 = inlined_call_operand.hbm [shape: bf16[128,128], index: 3, kind: input, shape index: {}]   ;;  %s3080_s4 = inlined_call_operand.vmem [shape: f32[1,128], index: 4, kind: input, shape index: {}]   ;;  %s3081_s5 = inlined_call_operand.hbm [shape: bf16[128,128], index: 5, kind: input, shape index: {}]   ;;  %s3082_s6 = inlined_call_operand.vmem [shape: f32[1,128], index: 6, kind: input, shape index: {}]   ;;  %s3083_s7 = inlined_call_operand.hbm [shape: bf16[128,256], index: 7, kind: input, shape index: {}]   ;;  %s3084_s8 = inlined_call_operand.vmem [shape: f32[1,256], index: 8, kind: input, shape index: {}]   ;;  %s3085_s9 = inlined_call_operand.hbm [shape: f32[1024,256], index: 9, kind: output, shape index: {}]  }
   0x1   :  { %3092 = sst [smem:[#allocation18_spill]] %s3085_s9 }
   0x2   :  { %14 = vsyncpa [#allocation3], 0 }
   0x3   :  { %16 = vsyncpa [#allocation3 + $0x1], 0 }
   0x4   :  { %17 = vsyncpa [#allocation6], 0 }
   0x5   :  { %18 = vsyncpa [#allocation9], 0 }
   0x6   :  { %19 = vsyncpa [#allocation4], 0 }
   0x7   :  { %21 = vsyncpa [#allocation4 + $0x1], 0  ;;  %s2483_s30 = smov 0   ;;  %s2485_s10 = smov 0  }
   0x8   :  { %s2487_s11 = smov 0   ;;  %s2489_s12 = smov 0  }
   0x9 LB: > { %3093 = sst [smem:[#allocation16_spill]] %s2406_s30  ;;  %s2504_s13 = sadd.s32 4294967295, %s2418_s12   ;;  %s2418_s12 = sphi %s2489_s12, %s3116_s12   ;;  %s2414_s11 = sphi %s2487_s11, %s3115_s11   ;;  %s2410_s10 = sphi %s2485_s10, %s3114_s10   ;;  %s2406_s30 = sphi %s2483_s30, %s3113_s30  }
   0xa   : > { %s1759_s14 = sadd.s32 4294967294, %s2418_s12   ;;  %p47_p0 = scmp.ne.s32.totalorder %s2410_s10, %s2406_s30 }
   0xb   : > { %p3086_p1 = scmp.eq.s32.totalorder %s2504_s13, 0  ;;  %p245_p3 = scmp.eq.s32.totalorder %s1759_s14, 3 }
   0xc   : > { %p1760_p5 = scmp.ge.s32.totalorder %s2418_s12, 1  ;;  %p252_p7 = scmp.lt.s32.totalorder %s2418_s12, 5 }
   0xd   : > { %p2513_p4 = por %p3086_p1, %p47_p0  ;;  %p2518_p6 = por %p245_p3, %p47_p0 }
   0xe   : > { %p2523_p8 = pnand %p1760_p5, %p252_p7  ;;  %s2420_s18 = smov [#allocation5]  }
   0xf   : > { %s3094_s15 = scalar_select %p2513_p4, 1, 0 }
  0x10   : > { %s3095_s16 = scalar_select %p2518_p6, 1, 0 }
  0x11   : > { %s3097_s17 = scalar_select %p2523_p8, 1, 0 }
  0x12   : > { %3096 = sst [smem:[#allocation17_spill]] %s3095_s16  ;;  %s264_s19 = sshll.u32 %s2420_s18, 4  ;;  %s2527_s19 = int_to_ptr.vmem [resolvable:$true] %s264_s19 }
  0x13   : > { %p2080_p9 = pneg %p2523_p8  ;;  %s2421_s21 = smov [#allocation8]  }
  0x14   : > { %s296_s22 = sshll.u32 %s2421_s21, 4  ;;  %s2422_s23 = smov [#allocation7]   ;;  %s2537_s22 = int_to_ptr.vmem [resolvable:$true] %s296_s22 }
  0x15   : > { %p2533_p10 = pnand %p2080_p9, %p3086_p1  ;;  %s2539_s24 = sshll.u32 %s2422_s23, 4  ;;  %s281_s24 = int_to_ptr.vmem [resolvable:$true] %s2539_s24 }
  0x16   : > { %s2202_s27 = scalar_lea.hbm %s3077_s1, 1024 }
  0x17   : > { %p2203_p11 = scmp.ne.s32.totalorder %s3077_s1, %s2202_s27  ;;  %p2549_p12 = pneg %p2533_p10 }
  0x18   : > { %p2209_p3 = scmp.lt.u32.totalorder %s2202_s27, %s3077_s1 }
  0x19   : > { %p2205_p13 = pnand %p2549_p12, %p2203_p11 }
  0x1b   : > { %p2206_p0 = pneg %p2205_p13 }
  0x1d   : > { %p2211_p5 = pnand %p2209_p3, %p2206_p0 }
  0x1f   : > { %2214 = shalt.err (!%p2211_p5)
}
  0x20   : > { %s2215_s23 = scalar_lea.vmem %s2527_s19, 1024  ;;  %p2223_p2 = scmp.lt.s32.totalorder %s2527_s19, %s2527_s19 }
  0x21   : > { %p2216_p7 = scmp.ne.s32.totalorder %s2527_s19, %s2215_s23  ;;  %p2224_p6 = scmp.lt.s32.totalorder %s2215_s23, %s2215_s23 }
  0x23   : > { %p2218_p9 = pnand %p2216_p7, %p2549_p12  ;;  %p2225_p11 = por %p2224_p6, %p2223_p2 }
  0x25   : > { %p2219_p1 = pneg %p2218_p9 }
  0x27   : > { %p2226_p13 = pnand %p2225_p11, %p2219_p1 }
  0x29   : > { %2229 = shalt.err (!%p2226_p13)
}
  0x2a   : > { %s2423_s25 = smov 64   ;;  %s2424_s26 = smov 4  }
  0x2b   : > { %2083 = dma.hbm_to_vmem [thread:$0]  (!%p2533_p10), %s3077_s1, 1024, %s2527_s19, [#allocation6], %s2423_s25, %s2423_s25, %s2424_s26  }
  0x2c   : > { %s2230_s21 = scalar_lea.hbm %s3081_s5, 1024 }
  0x2d   : > { %p2231_p1 = scmp.ne.s32.totalorder %s3081_s5, %s2230_s21  ;;  %p2237_p0 = scmp.lt.u32.totalorder %s2230_s21, %s3081_s5 }
  0x2f   : > { %p2233_p2 = pnand %p2231_p1, %p2549_p12 }
  0x31   : > { %p2234_p6 = pneg %p2233_p2 }
  0x33   : > { %p2239_p3 = pnand %p2237_p0, %p2234_p6 }
  0x35   : > { %2242 = shalt.err (!%p2239_p3)
}
  0x36   : > { %s2243_s19 = scalar_lea.vmem %s2537_s22, 1024  ;;  %p2251_p11 = scmp.lt.s32.totalorder %s2537_s22, %s2537_s22 }
  0x37   : > { %p2244_p5 = scmp.ne.s32.totalorder %s2537_s22, %s2243_s19  ;;  %p2252_p13 = scmp.lt.s32.totalorder %s2243_s19, %s2243_s19 }
  0x39   : > { %p2246_p7 = pnand %p2244_p5, %p2549_p12  ;;  %p2253_p1 = por %p2252_p13, %p2251_p11 }
  0x3b   : > { %p2247_p9 = pneg %p2246_p7 }
  0x3d   : > { %p2254_p2 = pnand %p2253_p1, %p2247_p9 }
  0x3f   : > { %2257 = shalt.err (!%p2254_p2)
}
  0x40   : > { %2089 = dma.hbm_to_vmem [thread:$0]  (!%p2533_p10), %s3081_s5, 1024, %s2537_s22, [#allocation9], %s2423_s25, %s2423_s25, %s2424_s26  }
  0x41   : > { %s2258_s28 = scalar_lea.hbm %s3079_s3, 1024 }
  0x42   : > { %p2259_p6 = scmp.ne.s32.totalorder %s3079_s3, %s2258_s28  ;;  %p2265_p5 = scmp.lt.u32.totalorder %s2258_s28, %s3079_s3 }
  0x44   : > { %p2261_p0 = pnand %p2259_p6, %p2549_p12 }
  0x46   : > { %p2262_p3 = pneg %p2261_p0 }
  0x48   : > { %p2267_p7 = pnand %p2265_p5, %p2262_p3 }
  0x4a   : > { %2270 = shalt.err (!%p2267_p7)
}
  0x4b   : > { %s2271_s19 = scalar_lea.vmem %s281_s24, 1024  ;;  %p2279_p1 = scmp.lt.s32.totalorder %s281_s24, %s281_s24 }
  0x4c   : > { %p2272_p9 = scmp.ne.s32.totalorder %s281_s24, %s2271_s19  ;;  %p2280_p2 = scmp.lt.s32.totalorder %s2271_s19, %s2271_s19 }
  0x4e   : > { %p2274_p11 = pnand %p2272_p9, %p2549_p12  ;;  %p2281_p4 = por %p2280_p2, %p2279_p1 }
  0x50   : > { %p2275_p13 = pneg %p2274_p11 }
  0x52   : > { %p2282_p8 = pnand %p2281_p4, %p2275_p13 }
  0x54   : > { %2285 = shalt.err (!%p2282_p8)
}
  0x55   : > { %2086 = dma.hbm_to_vmem [thread:$0]  (!%p2533_p10), %s3079_s3, 1024, %s281_s24, [#allocation6], %s2423_s25, %s2423_s25, %s2424_s26  }
  0x56   : > { %s2425_s30 = smov [#allocation10]   ;;  %s2286_s29 = scalar_lea.hbm %s3083_s7, 2048 }
  0x57   : > { %s312_s16 = sshll.u32 %s2425_s30, 4  ;;  %p2287_p4 = scmp.ne.s32.totalorder %s3083_s7, %s2286_s29  ;;  %s313_s16 = int_to_ptr.vmem [resolvable:$true] %s312_s16 }
  0x58   : > { %p2293_p0 = scmp.lt.u32.totalorder %s2286_s29, %s3083_s7 }
  0x59   : > { %p2289_p8 = pnand %p2287_p4, %p2549_p12 }
  0x5b   : > { %p2290_p6 = pneg %p2289_p8 }
  0x5d   : > { %p2295_p3 = pnand %p2293_p0, %p2290_p6 }
  0x5f   : > { %2298 = shalt.err (!%p2295_p3)
}
  0x60   : > { %s2299_s24 = scalar_lea.vmem %s313_s16, 2048  ;;  %p2307_p11 = scmp.lt.s32.totalorder %s313_s16, %s313_s16 }
  0x61   : > { %p2300_p5 = scmp.ne.s32.totalorder %s313_s16, %s2299_s24  ;;  %p2308_p13 = scmp.lt.s32.totalorder %s2299_s24, %s2299_s24 }
  0x63   : > { %p2302_p7 = pnand %p2300_p5, %p2549_p12  ;;  %p2309_p1 = por %p2308_p13, %p2307_p11 }
  0x65   : > { %p2303_p9 = pneg %p2302_p7 }
  0x67   : > { %p2310_p2 = pnand %p2309_p1, %p2303_p9 }
  0x69   : > { %2313 = shalt.err (!%p2310_p2)
}
  0x6a   : > { %s2426_s25 = smov 128   ;;  %s2427_s14 = smov 8  }
  0x6b   : > { %2092 = dma.hbm_to_vmem [thread:$0]  (!%p2533_p10), %s3083_s7, 2048, %s313_s16, [#allocation9], %s2426_s25, %s2426_s25, %s2427_s14  }
  0x6c   : > { %s2643_s9 = sadd.s32 1, %s2418_s12   ;;  %s34_s27 = sadd.s32 1, %s2414_s11 }
  0x6d   : > { %s31_s30 = ssub.s32 %s2418_s12, %s2643_s9  ;;  %p41_p4 = scmp.ne.s32.totalorder %s2414_s11, %s2410_s10 }
  0x6e   : > { %p32_p12 = scmp.eq.s32.totalorder %s31_s30, 0  ;;  %p42_p8 = scmp.eq.s32.totalorder %s2418_s12, 0 }
  0x6f   : > { %p3100_p0 = scmp.eq.s32.totalorder %s2504_s13, 3  ;;  %p2105_p5 = scmp.lt.s32.totalorder %s2418_s12, 4 }
  0x70   : > { %s2652_s28 = scalar_select %p32_p12, %s2414_s11, %s34_s27  }
  0x71   : > { %p43_p6 = por %p42_p8, %p41_p4  ;;  %p2656_p3 = por %p3100_p0, %p41_p4 }
  0x72   : > { %s329_s29 = sand.u32 1, %s2414_s11   ;;  %s1825_s16 = sshll.u32 %s2418_s12, 12 }
  0x73   : > { %s1766_s18 = sshll.u32 %s329_s29, 8  ;;  %s2666_s19 = scalar_lea.hbm %s3076_s0, %s1825_s16 }
  0x74   : > { %s333_s24 = scalar_lea.vmem [#allocation2], %s1766_s18  ;;  %p2670_p10 = pnand %p2105_p5, %p43_p6 }
  0x75   : > { %s340_s26 = sshll.u32 %s333_s24, 4  ;;  %s2674_s30 = scalar_lea.sflag [#allocation3], %s329_s29  ;;  %s2668_s26 = int_to_ptr.vmem [resolvable:$true] %s340_s26 }
  0x76   : > { %s2314_s27 = scalar_lea.hbm %s2666_s19, 4096  ;;  %p2316_p9 = pneg %p2670_p10 }
  0x77   : > { %p2315_p7 = scmp.ne.s32.totalorder %s2666_s19, %s2314_s27  ;;  %s2319_s21 = scalar_lea.hbm %s3076_s0, 16384 }
  0x78   : > { %p2320_p1 = scmp.lt.u32.totalorder %s2666_s19, %s3076_s0  ;;  %p2321_p2 = scmp.lt.u32.totalorder %s2319_s21, %s2314_s27 }
  0x79   : > { %p2317_p11 = pnand %p2316_p9, %p2315_p7  ;;  %p2323_p4 = scmp.lt.u32.totalorder %s2314_s27, %s2666_s19 }
  0x7a   : > { %p2322_p12 = por %p2321_p2, %p2320_p1 }
  0x7b   : > { %p2318_p13 = pneg %p2317_p11 }
  0x7c   : > { %p2324_p8 = por %p2323_p4, %p2322_p12 }
  0x7e   : > { %p2325_p6 = pnand %p2324_p8, %p2318_p13 }
  0x80   : > { %2328 = shalt.err (!%p2325_p6)
}
  0x81   : > { %s2329_s29 = scalar_lea.vmem %s2668_s26, 4096  ;;  %s2428_s18 = smov [#allocation2]  }
  0x82   : > { %p2330_p0 = scmp.ne.s32.totalorder %s2668_s26, %s2329_s29  ;;  %s2334_s16 = sshll.u32 %s2428_s18, 4  ;;  %s2335_s16 = int_to_ptr.vmem [resolvable:$false] %s2334_s16 }
  0x83   : > { %s2336_s23 = scalar_lea.vmem %s2335_s16, 8192  ;;  %p2337_p11 = scmp.lt.s32.totalorder %s2668_s26, %s2335_s16 }
  0x84   : > { %p2332_p5 = pnand %p2330_p0, %p2316_p9  ;;  %p2338_p1 = scmp.lt.s32.totalorder %s2336_s23, %s2329_s29 }
  0x86   : > { %p2333_p7 = pneg %p2332_p5  ;;  %p2339_p2 = por %p2338_p1, %p2337_p11 }
  0x88   : > { %p2340_p12 = pnand %p2339_p2, %p2333_p7 }
  0x8a   : > { %2343 = shalt.err (!%p2340_p12)
}
  0x8b   : > { %2096 = dma.hbm_to_vmem [thread:$0]  (!%p2670_p10), %s2666_s19, 4096, %s2668_s26, %s2674_s30, %s2426_s25, %s2426_s25, %s2427_s14  }
  0x8c   : > { %p3103_p9 = scmp.ne.s32.totalorder %s3097_s17, 0 }
  0x8d   : > { %s2708_s27 = sand.u32 (!%p3103_p9), 1, %s2410_s10   ;;  %p3104_p13 = scmp.ne.s32.totalorder (!%p3103_p9), %s3094_s15, 0 }
  0x8e   : > { %352 = sbr.rel (%p3103_p9) target bundleno = 1205 (0x4b5), region = 56  ;;  %s1770_s21 = sshll.u32 (!%p3103_p9), %s2708_s27, 8 }
  0x8f   : > { %s355_s24 = scalar_lea.sflag (!%p3103_p9), [#allocation3], %s2708_s27  ;;  %s2712_s29 = scalar_lea.vmem (!%p3103_p9), [#allocation2], %s1770_s21 }
  0x95   : > { %2389 = dma.done.wait (%p3104_p13), %s355_s24, 4096  }
  0x96   : > { %2391 = vsyncadd (%p3104_p13), %s355_s24, 4294963200  ;;  %p3105_p10 = scmp.eq.s32.totalorder %s2504_s13, 0 }
  0x98   : > { %2393 = dma.done.wait (%p3105_p10), [#allocation6], 2048   ;;  %p3106_p4 = pmov %p3105_p10 }
  0x9a   : > { %2395 = vsyncadd (%p3106_p4), [#allocation6], 4294965248  ;;  %p3107_p8 = pmov %p3106_p4 }
  0x9b   : > { %p3108_p6 = pmov %p3106_p4 }
  0x9c   : > { %2397 = dma.done.wait (%p3107_p8), [#allocation9], 3072  }
  0x9d   : > { %2399 = vsyncadd (%p3108_p6), [#allocation9], 4294964224  ;;  %v2154_v0 = vld [vmem:[#allocation5] sm:$0xff]   ;;  %v2155_v1 = vld [vmem:[#allocation5 + $0x8] sm:$0xff]   ;;  %s1775_s18 = sshll.u32 %s2708_s27, 9  ;;  %s1827_s23 = sshll.u32 %s2504_s13, 13 }
  0x9e   : > { %1900 = vmatprep.subr.bf16.mxu0 %v2154_v0  ;;  %v2156_v2 = vld [vmem:[#allocation5 + $0x10] sm:$0xff]   ;;  %v2157_v3 = vld [vmem:[#allocation5 + $0x18] sm:$0xff]   ;;  %v412_v4 = vld [vmem:[%s2712_s29] sm:$0xff]  ;;  %s2898_s16 = scalar_lea.vmem [#allocation11], %s1775_s18  ;;  %s3109_s15 = sld [smem:[#allocation18_spill]] }
  0x9f   : > { %1901 = vmatpush3.bf16.msra.mxu0 %v2154_v0  ;;  %v413_v5 = vld [vmem:[%s2712_s29 + $0x8] sm:$0xff]  ;;  %v2158_v7 = vld [vmem:[#allocation5 + $0x20] sm:$0xff]   ;;  %v2160_v10 = vld [vmem:[#allocation5 + $0x30] sm:$0xff]   ;;  %s1648_s21 = sshll.u32 %s2898_s16, 4  ;;  %s1634_s13 = scalar_lea.sflag [#allocation4], %s2708_s27  ;;  %s3029_s21 = int_to_ptr.vmem [resolvable:$true] %s1648_s21 }
  0xa0   : > { %1902 = vmatprep.subr.bf16.mxu0 %v2155_v1  ;;  %v444_v6 = vpack.c.bf16 %v413_v5, %v412_v4  ;;  %v2159_v8 = vld [vmem:[#allocation5 + $0x28] sm:$0xff]   ;;  %v2162_v9 = vld [vmem:[#allocation7] sm:$0xff]   ;;  %v2161_v12 = vld [vmem:[#allocation5 + $0x38] sm:$0xff]   ;;  %s2344_s25 = scalar_lea.vmem %s3029_s21, 8192  ;;  %s2430_s14 = smov [#allocation11]  }
  0xa1   : > { %v2163_v11 = vld [vmem:[#allocation7 + $0x8] sm:$0xff]   ;;  %2044 = vmatprep.subr.bf16.mxu1 %v2162_v9  ;;  %v414_v13 = vld [vmem:[%s2712_s29 + $0x10] sm:$0xff]  ;;  %v415_v14 = vld [vmem:[%s2712_s29 + $0x18] sm:$0xff]  ;;  %p2345_p0 = scmp.ne.s32.totalorder %s3029_s21, %s2344_s25  ;;  %s2348_s19 = sshll.u32 %s2430_s14, 4  ;;  %s2349_s19 = int_to_ptr.vmem [resolvable:$false] %s2348_s19 }
  0xa2   : > { %1916 = vmatprep.mubr.bf16.mxu0 %v444_v6  ;;  %2052 = vmatpush3.bf16.msra.mxu1 %v2162_v9  ;;  %v2164_v15 = vld [vmem:[#allocation7 + $0x10] sm:$0xff]   ;;  %v416_v16 = vld [vmem:[%s2712_s29 + $0x20] sm:$0xff]  ;;  %v417_v17 = vld [vmem:[%s2712_s29 + $0x28] sm:$0xff]  ;;  %v445_v19 = vpack.c.bf16 %v415_v14, %v414_v13  ;;  %s2350_s26 = scalar_lea.vmem %s2349_s19, 16384  ;;  %p2351_p11 = scmp.lt.s32.totalorder %s3029_s21, %s2349_s19 }
  0xa3   : > { %1903 = vmatpush3.bf16.msra.mxu0 %v2155_v1  ;;  %2045 = vmatprep.subr.bf16.mxu1 %v2163_v11  ;;  %v2165_v18 = vld [vmem:[#allocation7 + $0x18] sm:$0xff]   ;;  %v446_v20 = vpack.c.bf16 %v417_v17, %v416_v16  ;;  %v2166_v21 = vld [vmem:[#allocation7 + $0x20] sm:$0xff]   ;;  %v418_v22 = vld [vmem:[%s2712_s29 + $0x30] sm:$0xff]  ;;  %p2346_p5 = pnand %p2345_p0, %p2656_p3  ;;  %p2352_p1 = scmp.lt.s32.totalorder %s2350_s26, %s2344_s25 }
  0xa4   : > { %1904 = vmatprep.subr.bf16.mxu0 %v2156_v2  ;;  %v419_v23 = vld [vmem:[%s2712_s29 + $0x38] sm:$0xff]  ;;  %v420_v24 = vld [vmem:[%s2712_s29 + $0x40] sm:$0xff]  ;;  %v421_v25 = vld [vmem:[%s2712_s29 + $0x48] sm:$0xff]  ;;  %s3027_s17 = scalar_lea.hbm %s3109_s15, %s1827_s23 }
  0xa5   : > { %v2167_v26 = vld [vmem:[#allocation7 + $0x28] sm:$0xff]   ;;  %v447_v27 = vpack.c.bf16 %v419_v23, %v418_v22  ;;  %v448_v28 = vpack.c.bf16 %v421_v25, %v420_v24  ;;  %v2168_v29 = vld [vmem:[#allocation7 + $0x30] sm:$0xff]   ;;  %v423_v31 = vld [vmem:[%s2712_s29 + $0x58] sm:$0xff]  ;;  %p2347_p7 = pneg %p2346_p5  ;;  %p2353_p2 = por %p2352_p1, %p2351_p11 }
  0xa6   : > { %2053 = vmatpush3.bf16.msra.mxu1 %v2163_v11  ;;  %v422_v30 = vld [vmem:[%s2712_s29 + $0x50] sm:$0xff]  ;;  %v424_v32 = vld [vmem:[%s2712_s29 + $0x60] sm:$0xff]  ;;  %v425_v33 = vld [vmem:[%s2712_s29 + $0x68] sm:$0xff] }
  0xa7   : > { %1905 = vmatpush3.bf16.msra.mxu0 %v2156_v2  ;;  %2046 = vmatprep.subr.bf16.mxu1 %v2164_v15  ;;  %v449_v34 = vpack.c.bf16 %v423_v31, %v422_v30  ;;  %v450_v35 = vpack.c.bf16 %v425_v33, %v424_v32  ;;  %v426_v36 = vld [vmem:[%s2712_s29 + $0x70] sm:$0xff]  ;;  %v427_v37 = vld [vmem:[%s2712_s29 + $0x78] sm:$0xff]  ;;  %v428_v38 = vld [vmem:[%s2712_s29 + $0x80] sm:$0xff]  ;;  %p2354_p12 = pnand %p2353_p2, %p2347_p7 }
  0xa8   : > { %1906 = vmatprep.subr.bf16.mxu0 %v2157_v3  ;;  %v429_v39 = vld [vmem:[%s2712_s29 + $0x88] sm:$0xff]  ;;  %v451_v40 = vpack.c.bf16 %v427_v37, %v426_v36  ;;  %v430_v42 = vld [vmem:[%s2712_s29 + $0x90] sm:$0xff]  ;;  %v431_v43 = vld [vmem:[%s2712_s29 + $0x98] sm:$0xff] }
  0xa9   : > { %v452_v41 = vpack.c.bf16 %v429_v39, %v428_v38  ;;  %v432_v44 = vld [vmem:[%s2712_s29 + $0xa0] sm:$0xff]  ;;  %v433_v45 = vld [vmem:[%s2712_s29 + $0xa8] sm:$0xff]  ;;  %v453_v46 = vpack.c.bf16 %v431_v43, %v430_v42  ;;  %v434_v48 = vld [vmem:[%s2712_s29 + $0xb0] sm:$0xff] }
  0xaa   : > { %2054 = vmatpush3.bf16.msra.mxu1 %v2164_v15  ;;  %v454_v47 = vpack.c.bf16 %v433_v45, %v432_v44  ;;  %v435_v49 = vld [vmem:[%s2712_s29 + $0xb8] sm:$0xff]  ;;  %v436_v50 = vld [vmem:[%s2712_s29 + $0xc0] sm:$0xff]  ;;  %v437_v51 = vld [vmem:[%s2712_s29 + $0xc8] sm:$0xff] }
  0xab   : > { %1907 = vmatpush3.bf16.msra.mxu0 %v2157_v3  ;;  %2047 = vmatprep.subr.bf16.mxu1 %v2165_v18  ;;  %v455_v52 = vpack.c.bf16 %v435_v49, %v434_v48  ;;  %v456_v53 = vpack.c.bf16 %v437_v51, %v436_v50  ;;  %v438_v54 = vld [vmem:[%s2712_s29 + $0xd0] sm:$0xff]  ;;  %v439_v55 = vld [vmem:[%s2712_s29 + $0xd8] sm:$0xff]  ;;  %v440_v56 = vld [vmem:[%s2712_s29 + $0xe0] sm:$0xff] }
  0xac   : > { %1908 = vmatprep.subr.bf16.mxu0 %v2158_v7  ;;  %v441_v57 = vld [vmem:[%s2712_s29 + $0xe8] sm:$0xff]  ;;  %v457_v58 = vpack.c.bf16 %v439_v55, %v438_v54  ;;  %v442_v60 = vld [vmem:[%s2712_s29 + $0xf0] sm:$0xff]  ;;  %v443_v61 = vld [vmem:[%s2712_s29 + $0xf8] sm:$0xff] }
  0xad   : > { %v458_v59 = vpack.c.bf16 %v441_v57, %v440_v56  ;;  %v459_v62 = vpack.c.bf16 %v443_v61, %v442_v60  ;;  %v2169_v63 = vld [vmem:[#allocation7 + $0x38] sm:$0xff]   ;;  %v2170_v0 = vld [vmem:[#allocation8] sm:$0xff]   ;;  %v2175_v36 = vld [vmem:[#allocation8 + $0x28] sm:$0xff]  }
  0xae   : > { %2055 = vmatpush3.bf16.msra.mxu1 %v2165_v18  ;;  %v2761_v2 = vld [vmem:[%s3078_s2] ss:$0 sm:$0xff]  ;;  %v2173_v24 = vld [vmem:[#allocation8 + $0x18] sm:$0xff]  }
  0xaf   : > { %1909 = vmatpush3.bf16.msra.mxu0 %v2158_v7  ;;  %2048 = vmatprep.subr.bf16.mxu1 %v2166_v21  ;;  %v2174_v32 = vld [vmem:[#allocation8 + $0x20] sm:$0xff]  }
  0xb0   : > { %1910 = vmatprep.subr.bf16.mxu0 %v2159_v8 }
  0xb2   : > { %2056 = vmatpush3.bf16.msra.mxu1 %v2166_v21 }
  0xb3   : > { %1911 = vmatpush3.bf16.msra.mxu0 %v2159_v8  ;;  %2049 = vmatprep.subr.bf16.mxu1 %v2167_v26 }
  0xb4   : > { %1912 = vmatprep.subr.bf16.mxu0 %v2160_v10 }
  0xb6   : > { %2057 = vmatpush3.bf16.msra.mxu1 %v2167_v26 }
  0xb7   : > { %1913 = vmatpush3.bf16.msra.mxu0 %v2160_v10  ;;  %2050 = vmatprep.subr.bf16.mxu1 %v2168_v29 }
  0xb8   : > { %1914 = vmatprep.subr.bf16.mxu0 %v2161_v12 }
  0xba   : > { %2058 = vmatpush3.bf16.msra.mxu1 %v2168_v29 }
  0xbb   : > { %1915 = vmatpush3.bf16.msra.mxu0 %v2161_v12  ;;  %2051 = vmatprep.subr.bf16.mxu1 %v2169_v63  ;;  %v2171_v12 = vld [vmem:[#allocation8 + $0x8] sm:$0xff]  }
  0xbc   : > { %1948 = vmatprep.subr.bf16.mxu0 %v2162_v9 }
  0xbe   : > { %1917 = vmatmul.mubr.bf16.vlgmr.msra.gmra.mrb[0].mxu0 %v445_v19  ;;  %2059 = vmatpush3.bf16.msra.mxu1 %v2169_v63 }
  0xbf   : > { %1920 = vmatprep.mubr.bf16.mxu0 %v446_v20  ;;  %1949 = vmatpush3.bf16.msra.mxu0 %v2162_v9  ;;  %v2172_v20 = vld [vmem:[#allocation8 + $0x10] sm:$0xff]  }
  0xc0   : > { %1950 = vmatprep.subr.bf16.mxu0 %v2163_v11 }
  0xc3   : > { %1951 = vmatpush3.bf16.msra.mxu0 %v2163_v11 }
  0xc4   : > { %1952 = vmatprep.subr.bf16.mxu0 %v2164_v15 }
  0xc6   : > { %1921 = vmatmul.mubr.bf16.gmra.mrb[4].mxu0 %v447_v27 }
  0xc7   : > { %1924 = vmatprep.mubr.bf16.mxu0 %v448_v28  ;;  %1953 = vmatpush3.bf16.msra.mxu0 %v2164_v15 }
  0xc8   : > { %1954 = vmatprep.subr.bf16.mxu0 %v2165_v18 }
  0xcb   : > { %1955 = vmatpush3.bf16.msra.mxu0 %v2165_v18 }
  0xcc   : > { %1956 = vmatprep.subr.bf16.mxu0 %v2166_v21 }
  0xce   : > { %1925 = vmatmul.mubr.bf16.gmra.mrb[8].mxu0 %v449_v34 }
  0xcf   : > { %1928 = vmatprep.mubr.bf16.mxu0 %v450_v35  ;;  %1957 = vmatpush3.bf16.msra.mxu0 %v2166_v21 }
  0xd0   : > { %1958 = vmatprep.subr.bf16.mxu0 %v2167_v26 }
  0xd3   : > { %1959 = vmatpush3.bf16.msra.mxu0 %v2167_v26 }
  0xd4   : > { %1960 = vmatprep.subr.bf16.mxu0 %v2168_v29 }
  0xd6   : > { %1929 = vmatmul.mubr.bf16.gmra.mrb[12].mxu0 %v451_v40 }
  0xd7   : > { %1932 = vmatprep.mubr.bf16.mxu0 %v452_v41  ;;  %1961 = vmatpush3.bf16.msra.mxu0 %v2168_v29 }
  0xd8   : > { %1962 = vmatprep.subr.bf16.mxu0 %v2169_v63 }
  0xdb   : > { %1963 = vmatpush3.bf16.msra.mxu0 %v2169_v63 }
  0xdc   : > { %1996 = vmatprep.subr.bf16.mxu0 %v2170_v0 }
  0xde   : > { %1933 = vmatmul.mubr.bf16.gmra.mrb[16].mxu0 %v453_v46 }
  0xdf   : > { %1936 = vmatprep.mubr.bf16.mxu0 %v454_v47 }
  0xe6   : > { %1937 = vmatmul.mubr.bf16.gmra.mrb[20].mxu0 %v455_v52 }
  0xe7   : > { %1940 = vmatprep.mubr.bf16.mxu0 %v456_v53 }
  0xee   : > { %1941 = vmatmul.mubr.bf16.gmra.mrb[24].mxu0 %v457_v58 }
  0xef   : > { %1944 = vmatprep.mubr.bf16.mxu0 %v458_v59 }
  0xf6   : > { %1945 = vmatmul.mubr.bf16.gmra.mrb[28].mxu0 %v459_v62 }
 0x191   : > { %v1918_v1 = vpop.f32.mrb[0].mxu0 }
 0x192   : > { %v565_v3 = vpop.f32.mrb[1].mxu0  ;;  %v574_v5 = vadd.f32 %v1918_v1, %v2761_v2 }
 0x193   : > { %v1919_v4 = vpop.f32.mrb[2].mxu0  ;;  %v566_v8 = vadd.f32 %v2761_v2, %v565_v3 }
 0x194   : > { %v577_v6 = vadd.f32 %v1919_v4, %v2761_v2  ;;  %v568_v7 = vpop.f32.mrb[3].mxu0 }
 0x195   : > { %v569_v9 = vadd.f32 %v2761_v2, %v568_v7 }
 0x196   : > { %v693_v10 = vpack.c.bf16 %v577_v6, %v574_v5 }
 0x197   : > { %v692_v11 = vpack.c.bf16 %v569_v9, %v566_v8 }
 0x199   : > { %v1922_v13 = vpop.f32.mrb[4].mxu0  ;;  %1964 = vmatprep.mubr.bf16.mxu0 %v692_v11 }
 0x19a   : > { %v590_v14 = vadd.f32 %v1922_v13, %v2761_v2  ;;  %v581_v15 = vpop.f32.mrb[5].mxu0  ;;  %1965 = vmatmul.mubr.bf16.vlgmr.msra.gmra.mrb[32].mxu0 %v693_v10 }
 0x19b   : > { %v582_v16 = vadd.f32 %v2761_v2, %v581_v15  ;;  %v1923_v17 = vpop.f32.mrb[6].mxu0  ;;  %1997 = vmatpush3.bf16.msra.mxu0 %v2170_v0 }
 0x19c   : > { %v593_v18 = vadd.f32 %v1923_v17, %v2761_v2  ;;  %v584_v19 = vpop.f32.mrb[7].mxu0  ;;  %1998 = vmatprep.subr.bf16.mxu0 %v2171_v12 }
 0x19d   : > { %v585_v21 = vadd.f32 %v2761_v2, %v584_v19 }
 0x19e   : > { %v695_v22 = vpack.c.bf16 %v593_v18, %v590_v14 }
 0x19f   : > { %v694_v23 = vpack.c.bf16 %v585_v21, %v582_v16  ;;  %1999 = vmatpush3.bf16.msra.mxu0 %v2171_v12 }
 0x1a0   : > { %2000 = vmatprep.subr.bf16.mxu0 %v2172_v20 }
 0x1a1   : > { %1968 = vmatprep.mubr.bf16.mxu0 %v694_v23  ;;  %v1926_v25 = vpop.f32.mrb[8].mxu0 }
 0x1a2   : > { %1969 = vmatmul.mubr.bf16.gmra.mrb[36].mxu0 %v695_v22  ;;  %v606_v26 = vadd.f32 %v1926_v25, %v2761_v2  ;;  %v597_v27 = vpop.f32.mrb[9].mxu0  ;;  %v2177_v25 = vld [vmem:[#allocation8 + $0x38] sm:$0xff]  }
 0x1a3   : > { %v598_v28 = vadd.f32 %v2761_v2, %v597_v27  ;;  %v1927_v29 = vpop.f32.mrb[10].mxu0  ;;  %2001 = vmatpush3.bf16.msra.mxu0 %v2172_v20  ;;  %v2180_v27 = vld [vmem:[#allocation10 + $0x4] ss:$8 sps:$4 sm:$0xff]  }
 0x1a4   : > { %v609_v30 = vadd.f32 %v1927_v29, %v2761_v2  ;;  %v600_v31 = vpop.f32.mrb[11].mxu0  ;;  %2002 = vmatprep.subr.bf16.mxu0 %v2173_v24  ;;  %1376 = vmatprep.subr.bf16.mxu1 %v2180_v27  ;;  %v2181_v29 = vld [vmem:[#allocation10 + $0x10] ss:$8 sps:$4 sm:$0xff]  }
 0x1a5   : > { %v601_v33 = vadd.f32 %v2761_v2, %v600_v31  ;;  %v2189_v31 = vld [vmem:[#allocation10 + $0x34] ss:$8 sps:$4 sm:$0xff]  }
 0x1a6   : > { %v697_v34 = vpack.c.bf16 %v609_v30, %v606_v26  ;;  %v2178_v26 = vld [vmem:[#allocation10] ss:$8 sps:$4 sm:$0xff]   ;;  %v2186_v30 = vld [vmem:[#allocation10 + $0x24] ss:$8 sps:$4 sm:$0xff]  }
 0x1a7   : > { %v696_v35 = vpack.c.bf16 %v601_v33, %v598_v28  ;;  %2003 = vmatpush3.bf16.msra.mxu0 %v2173_v24  ;;  %v2176_v24 = vld [vmem:[#allocation8 + $0x30] sm:$0xff]   ;;  %v2192_v33 = vld [vmem:[#allocation10 + $0x44] ss:$8 sps:$4 sm:$0xff]  }
 0x1a8   : > { %2004 = vmatprep.subr.bf16.mxu0 %v2174_v32  ;;  %v2183_v28 = vld [vmem:[#allocation10 + $0x14] ss:$8 sps:$4 sm:$0xff]  }
 0x1a9   : > { %1972 = vmatprep.mubr.bf16.mxu0 %v696_v35  ;;  %v1930_v37 = vpop.f32.mrb[12].mxu0  ;;  %v2195_v35 = vld [vmem:[#allocation10 + $0x54] ss:$8 sps:$4 sm:$0xff]  }
 0x1aa   : > { %1973 = vmatmul.mubr.bf16.gmra.mrb[40].mxu0 %v697_v34  ;;  %v622_v38 = vadd.f32 %v1930_v37, %v2761_v2  ;;  %v613_v39 = vpop.f32.mrb[13].mxu0  ;;  %v2190_v34 = vld [vmem:[#allocation10 + $0x40] ss:$8 sps:$4 sm:$0xff]  }
 0x1ab   : > { %v614_v40 = vadd.f32 %v2761_v2, %v613_v39  ;;  %v1931_v41 = vpop.f32.mrb[14].mxu0  ;;  %2005 = vmatpush3.bf16.msra.mxu0 %v2174_v32  ;;  %v2187_v32 = vld [vmem:[#allocation10 + $0x30] ss:$8 sps:$4 sm:$0xff]   ;;  %v2798_v37 = vld [vmem:[%s3080_s4] ss:$0 sm:$0xff] }
 0x1ac   : > { %v625_v42 = vadd.f32 %v1931_v41, %v2761_v2  ;;  %v616_v43 = vpop.f32.mrb[15].mxu0  ;;  %2006 = vmatprep.subr.bf16.mxu0 %v2175_v36 }
 0x1ad   : > { %v617_v44 = vadd.f32 %v2761_v2, %v616_v43 }
 0x1ae   : > { %v699_v45 = vpack.c.bf16 %v625_v42, %v622_v38 }
 0x1af   : > { %v698_v46 = vpack.c.bf16 %v617_v44, %v614_v40  ;;  %2007 = vmatpush3.bf16.msra.mxu0 %v2175_v36  ;;  %v2193_v36 = vld [vmem:[#allocation10 + $0x50] ss:$8 sps:$4 sm:$0xff]  }
 0x1b0   : > { %2008 = vmatprep.subr.bf16.mxu0 %v2176_v24 }
 0x1b1   : > { %1976 = vmatprep.mubr.bf16.mxu0 %v698_v46  ;;  %v1934_v47 = vpop.f32.mrb[16].mxu0 }
 0x1b2   : > { %1977 = vmatmul.mubr.bf16.gmra.mrb[44].mxu0 %v699_v45  ;;  %v638_v48 = vadd.f32 %v1934_v47, %v2761_v2  ;;  %v629_v49 = vpop.f32.mrb[17].mxu0 }
 0x1b3   : > { %v630_v50 = vadd.f32 %v2761_v2, %v629_v49  ;;  %v1935_v51 = vpop.f32.mrb[18].mxu0  ;;  %2009 = vmatpush3.bf16.msra.mxu0 %v2176_v24 }
 0x1b4   : > { %v641_v52 = vadd.f32 %v1935_v51, %v2761_v2  ;;  %v632_v53 = vpop.f32.mrb[19].mxu0  ;;  %2010 = vmatprep.subr.bf16.mxu0 %v2177_v25 }
 0x1b5   : > { %v633_v54 = vadd.f32 %v2761_v2, %v632_v53 }
 0x1b6   : > { %v701_v55 = vpack.c.bf16 %v641_v52, %v638_v48 }
 0x1b7   : > { %v700_v56 = vpack.c.bf16 %v633_v54, %v630_v50  ;;  %2011 = vmatpush3.bf16.msra.mxu0 %v2177_v25 }
 0x1b9   : > { %1980 = vmatprep.mubr.bf16.mxu1 %v700_v56  ;;  %v1938_v57 = vpop.f32.mrb[20].mxu0 }
 0x1ba   : > { %1981 = vmatmul.mubr.bf16.vlgmr.msra.gmra.mrb[0].mxu1 %v701_v55  ;;  %v654_v58 = vadd.f32 %v1938_v57, %v2761_v2  ;;  %v645_v59 = vpop.f32.mrb[21].mxu0 }
 0x1bb   : > { %v646_v60 = vadd.f32 %v2761_v2, %v645_v59  ;;  %v1939_v61 = vpop.f32.mrb[22].mxu0  ;;  %1377 = vmatpush1.bf16.msra.mxu1 %v2178_v26 }
 0x1bc   : > { %v657_v62 = vadd.f32 %v1939_v61, %v2761_v2  ;;  %v648_v63 = vpop.f32.mrb[23].mxu0  ;;  %1378 = vmatprep.subr.bf16.mxu1 %v2183_v28 }
 0x1bd   : > { %v649_v0 = vadd.f32 %v2761_v2, %v648_v63 }
 0x1be   : > { %v703_v1 = vpack.c.bf16 %v657_v62, %v654_v58 }
 0x1bf   : > { %v702_v3 = vpack.c.bf16 %v649_v0, %v646_v60  ;;  %1379 = vmatpush1.bf16.msra.mxu1 %v2181_v29 }
 0x1c0   : > { %1380 = vmatprep.subr.bf16.mxu1 %v2186_v30 }
 0x1c1   : > { %1984 = vmatprep.mubr.bf16.mxu1 %v702_v3  ;;  %v1942_v4 = vpop.f32.mrb[24].mxu0 }
 0x1c2   : > { %1985 = vmatmul.mubr.bf16.gmra.mrb[4].mxu1 %v703_v1  ;;  %v670_v5 = vadd.f32 %v1942_v4, %v2761_v2  ;;  %v661_v6 = vpop.f32.mrb[25].mxu0 }
 0x1c3   : > { %v662_v7 = vadd.f32 %v2761_v2, %v661_v6  ;;  %v1943_v8 = vpop.f32.mrb[26].mxu0 }
 0x1c4   : > { %v673_v9 = vadd.f32 %v1943_v8, %v2761_v2  ;;  %v664_v10 = vpop.f32.mrb[27].mxu0 }
 0x1c5   : > { %v665_v11 = vadd.f32 %v2761_v2, %v664_v10 }
 0x1c6   : > { %v705_v12 = vpack.c.bf16 %v673_v9, %v670_v5 }
 0x1c7   : > { %v704_v13 = vpack.c.bf16 %v665_v11, %v662_v7 }
 0x1c9   : > { %1988 = vmatprep.mubr.bf16.mxu1 %v704_v13  ;;  %v1946_v14 = vpop.f32.mrb[28].mxu0 }
 0x1ca   : > { %1989 = vmatmul.mubr.bf16.gmra.mrb[8].mxu1 %v705_v12  ;;  %v686_v15 = vadd.f32 %v1946_v14, %v2761_v2  ;;  %v677_v16 = vpop.f32.mrb[29].mxu0 }
 0x1cb   : > { %v678_v17 = vadd.f32 %v2761_v2, %v677_v16  ;;  %v1947_v18 = vpop.f32.mrb[30].mxu0 }
 0x1cc   : > { %v689_v19 = vadd.f32 %v1947_v18, %v2761_v2  ;;  %v680_v20 = vpop.f32.mrb[31].mxu0 }
 0x1cd   : > { %v681_v21 = vadd.f32 %v2761_v2, %v680_v20  ;;  %v2184_v2 = vld [vmem:[#allocation10 + $0x20] ss:$8 sps:$4 sm:$0xff]  }
 0x1ce   : > { %v707_v22 = vpack.c.bf16 %v689_v19, %v686_v15  ;;  %1381 = vmatpush1.bf16.msra.mxu1 %v2184_v2 }
 0x1cf   : > { %v706_v23 = vpack.c.bf16 %v681_v21, %v678_v17  ;;  %1382 = vmatprep.subr.bf16.mxu1 %v2189_v31 }
 0x1d1   : > { %1992 = vmatprep.mubr.bf16.mxu1 %v706_v23 }
 0x1d2   : > { %1993 = vmatmul.mubr.bf16.gmra.mrb[12].mxu1 %v707_v22 }
 0x1d3   : > { %1383 = vmatpush1.bf16.msra.mxu1 %v2187_v32 }
 0x1d4   : > { %1384 = vmatprep.subr.bf16.mxu1 %v2192_v33 }
 0x1d7   : > { %1385 = vmatpush1.bf16.msra.mxu1 %v2190_v34 }
 0x1d8   : > { %1386 = vmatprep.subr.bf16.mxu1 %v2195_v35 }
 0x1db   : > { %1387 = vmatpush1.bf16.msra.mxu1 %v2193_v36 }
 0x26d   : > { %v1966_v38 = vpop.f32.mrb[32].mxu0 }
 0x26e   : > { %v822_v39 = vadd.f32 %v1966_v38, %v2798_v37  ;;  %v813_v40 = vpop.f32.mrb[33].mxu0 }
 0x26f   : > { %v814_v41 = vadd.f32 %v2798_v37, %v813_v40  ;;  %v1967_v42 = vpop.f32.mrb[34].mxu0 }
 0x270   : > { %v825_v43 = vadd.f32 %v1967_v42, %v2798_v37  ;;  %v816_v44 = vpop.f32.mrb[35].mxu0  ;;  %v942_v46 = vmax.f32 %v822_v39, 0.0 }
 0x271   : > { %v817_v45 = vadd.f32 %v2798_v37, %v816_v44  ;;  %v940_v48 = vmax.f32 %v814_v41, 0.0 }
 0x272   : > { %v943_v47 = vmax.f32 %v825_v43, 0.0 }
 0x273   : > { %v941_v49 = vmax.f32 %v817_v45, 0.0 }
 0x274   : > { %v973_v50 = vpack.c.bf16 %v943_v47, %v942_v46 }
 0x275   : > { %v972_v51 = vpack.c.bf16 %v941_v49, %v940_v48  ;;  %v1970_v52 = vpop.f32.mrb[36].mxu0 }
 0x276   : > { %v838_v53 = vadd.f32 %v1970_v52, %v2798_v37  ;;  %v829_v54 = vpop.f32.mrb[37].mxu0 }
 0x277   : > { %v830_v55 = vadd.f32 %v2798_v37, %v829_v54  ;;  %v1971_v56 = vpop.f32.mrb[38].mxu0  ;;  %2012 = vmatprep.mubr.bf16.mxu0 %v972_v51 }
 0x278   : > { %v946_v57 = vmax.f32 %v838_v53, 0.0  ;;  %v841_v58 = vadd.f32 %v1971_v56, %v2798_v37  ;;  %v832_v59 = vpop.f32.mrb[39].mxu0  ;;  %2013 = vmatmul.mubr.bf16.vlgmr.msra.gmra.mrb[48].mxu0 %v973_v50 }
 0x279   : > { %v944_v60 = vmax.f32 %v830_v55, 0.0  ;;  %v833_v61 = vadd.f32 %v2798_v37, %v832_v59 }
 0x27a   : > { %v947_v62 = vmax.f32 %v841_v58, 0.0 }
 0x27b   : > { %v945_v63 = vmax.f32 %v833_v61, 0.0 }
 0x27c   : > { %v975_v0 = vpack.c.bf16 %v947_v62, %v946_v57 }
 0x27d   : > { %v974_v1 = vpack.c.bf16 %v945_v63, %v944_v60  ;;  %v1974_v3 = vpop.f32.mrb[40].mxu0 }
 0x27e   : > { %v854_v4 = vadd.f32 %v1974_v3, %v2798_v37  ;;  %v845_v5 = vpop.f32.mrb[41].mxu0 }
 0x27f   : > { %2016 = vmatprep.mubr.bf16.mxu0 %v974_v1  ;;  %v846_v6 = vadd.f32 %v2798_v37, %v845_v5  ;;  %v1975_v7 = vpop.f32.mrb[42].mxu0 }
 0x280   : > { %2017 = vmatmul.mubr.bf16.gmra.mrb[52].mxu0 %v975_v0  ;;  %v950_v8 = vmax.f32 %v854_v4, 0.0  ;;  %v857_v9 = vadd.f32 %v1975_v7, %v2798_v37  ;;  %v848_v10 = vpop.f32.mrb[43].mxu0 }
 0x281   : > { %v948_v11 = vmax.f32 %v846_v6, 0.0  ;;  %v849_v12 = vadd.f32 %v2798_v37, %v848_v10 }
 0x282   : > { %v951_v13 = vmax.f32 %v857_v9, 0.0 }
 0x283   : > { %v949_v14 = vmax.f32 %v849_v12, 0.0 }
 0x284   : > { %v977_v15 = vpack.c.bf16 %v951_v13, %v950_v8 }
 0x285   : > { %v976_v16 = vpack.c.bf16 %v949_v14, %v948_v11  ;;  %v1978_v17 = vpop.f32.mrb[44].mxu0 }
 0x286   : > { %v870_v18 = vadd.f32 %v1978_v17, %v2798_v37  ;;  %v861_v19 = vpop.f32.mrb[45].mxu0 }
 0x287   : > { %2020 = vmatprep.mubr.bf16.mxu0 %v976_v16  ;;  %v862_v20 = vadd.f32 %v2798_v37, %v861_v19  ;;  %v1979_v21 = vpop.f32.mrb[46].mxu0 }
 0x288   : > { %2021 = vmatmul.mubr.bf16.gmra.mrb[56].mxu0 %v977_v15  ;;  %v954_v22 = vmax.f32 %v870_v18, 0.0  ;;  %v873_v23 = vadd.f32 %v1979_v21, %v2798_v37  ;;  %v864_v24 = vpop.f32.mrb[47].mxu0 }
 0x289   : > { %v952_v25 = vmax.f32 %v862_v20, 0.0  ;;  %v865_v26 = vadd.f32 %v2798_v37, %v864_v24  ;;  %v2198_v24 = vld [vmem:[#allocation10 + $0x64] ss:$8 sps:$4 sm:$0xff]  }
 0x28a   : > { %v955_v27 = vmax.f32 %v873_v23, 0.0  ;;  %1388 = vmatprep.subr.bf16.mxu1 %v2198_v24 }
 0x28b   : > { %v953_v28 = vmax.f32 %v865_v26, 0.0  ;;  %v2201_v26 = vld [vmem:[#allocation10 + $0x74] ss:$8 sps:$4 sm:$0xff]  }
 0x28c   : > { %v979_v29 = vpack.c.bf16 %v955_v27, %v954_v22  ;;  %v2199_v27 = vld [vmem:[#allocation10 + $0x70] ss:$8 sps:$4 sm:$0xff]  }
 0x28d   : > { %v978_v30 = vpack.c.bf16 %v953_v28, %v952_v25  ;;  %v1982_v2 = vpop.f32.mrb[0].mxu1  ;;  %v2196_v25 = vld [vmem:[#allocation10 + $0x60] ss:$8 sps:$4 sm:$0xff]   ;;  %v2429_v28 = vmov 0  }
 0x28e   : > { %v886_v31 = vadd.f32 %v1982_v2, %v2798_v37  ;;  %v877_v32 = vpop.f32.mrb[1].mxu1  ;;  %1389 = vmatpush1.bf16.msra.mxu1 %v2196_v25  ;;  %1408 = vmatprep.mubr.bf16.mxu1 %v2429_v28 }
 0x28f   : > { %2024 = vmatprep.mubr.bf16.mxu0 %v978_v30  ;;  %v878_v33 = vadd.f32 %v2798_v37, %v877_v32  ;;  %v1983_v34 = vpop.f32.mrb[2].mxu1  ;;  %1390 = vmatprep.subr.bf16.mxu1 %v2201_v26 }
 0x290   : > { %2025 = vmatmul.mubr.bf16.gmra.mrb[60].mxu0 %v979_v29  ;;  %v958_v35 = vmax.f32 %v886_v31, 0.0  ;;  %v889_v36 = vadd.f32 %v1983_v34, %v2798_v37  ;;  %v880_v38 = vpop.f32.mrb[3].mxu1 }
 0x291   : > { %v956_v39 = vmax.f32 %v878_v33, 0.0  ;;  %v881_v40 = vadd.f32 %v2798_v37, %v880_v38 }
 0x292   : > { %v959_v41 = vmax.f32 %v889_v36, 0.0  ;;  %1391 = vmatpush1.bf16.msra.mxu1 %v2199_v27 }
 0x293   : > { %v957_v42 = vmax.f32 %v881_v40, 0.0 }
 0x294   : > { %v981_v43 = vpack.c.bf16 %v959_v41, %v958_v35 }
 0x295   : > { %v980_v44 = vpack.c.bf16 %v957_v42, %v956_v39  ;;  %v1986_v45 = vpop.f32.mrb[4].mxu1 }
 0x296   : > { %v902_v46 = vadd.f32 %v1986_v45, %v2798_v37  ;;  %v893_v47 = vpop.f32.mrb[5].mxu1 }
 0x297   : > { %2028 = vmatprep.mubr.bf16.mxu0 %v980_v44  ;;  %v894_v48 = vadd.f32 %v2798_v37, %v893_v47  ;;  %v1987_v49 = vpop.f32.mrb[6].mxu1 }
 0x298   : > { %2029 = vmatmul.mubr.bf16.gmra.mrb[64].mxu0 %v981_v43  ;;  %v962_v50 = vmax.f32 %v902_v46, 0.0  ;;  %v905_v51 = vadd.f32 %v1987_v49, %v2798_v37  ;;  %v896_v52 = vpop.f32.mrb[7].mxu1 }
 0x299   : > { %v960_v53 = vmax.f32 %v894_v48, 0.0  ;;  %v897_v54 = vadd.f32 %v2798_v37, %v896_v52 }
 0x29a   : > { %v963_v55 = vmax.f32 %v905_v51, 0.0 }
 0x29b   : > { %v961_v56 = vmax.f32 %v897_v54, 0.0 }
 0x29c   : > { %v983_v57 = vpack.c.bf16 %v963_v55, %v962_v50 }
 0x29d   : > { %v982_v58 = vpack.c.bf16 %v961_v56, %v960_v53  ;;  %v1990_v59 = vpop.f32.mrb[8].mxu1 }
 0x29e   : > { %v918_v60 = vadd.f32 %v1990_v59, %v2798_v37  ;;  %v909_v61 = vpop.f32.mrb[9].mxu1 }
 0x29f   : > { %2032 = vmatprep.mubr.bf16.mxu0 %v982_v58  ;;  %v910_v62 = vadd.f32 %v2798_v37, %v909_v61  ;;  %v1991_v63 = vpop.f32.mrb[10].mxu1 }
 0x2a0   : > { %2033 = vmatmul.mubr.bf16.gmra.mrb[68].mxu0 %v983_v57  ;;  %v966_v0 = vmax.f32 %v918_v60, 0.0  ;;  %v921_v1 = vadd.f32 %v1991_v63, %v2798_v37  ;;  %v912_v3 = vpop.f32.mrb[11].mxu1 }
 0x2a1   : > { %v964_v4 = vmax.f32 %v910_v62, 0.0  ;;  %v913_v5 = vadd.f32 %v2798_v37, %v912_v3 }
 0x2a2   : > { %v967_v6 = vmax.f32 %v921_v1, 0.0 }
 0x2a3   : > { %v965_v7 = vmax.f32 %v913_v5, 0.0 }
 0x2a4   : > { %v985_v8 = vpack.c.bf16 %v967_v6, %v966_v0 }
 0x2a5   : > { %v984_v9 = vpack.c.bf16 %v965_v7, %v964_v4  ;;  %v1994_v10 = vpop.f32.mrb[12].mxu1 }
 0x2a6   : > { %v934_v11 = vadd.f32 %v1994_v10, %v2798_v37  ;;  %v925_v12 = vpop.f32.mrb[13].mxu1 }
 0x2a7   : > { %2036 = vmatprep.mubr.bf16.mxu0 %v984_v9  ;;  %v926_v13 = vadd.f32 %v2798_v37, %v925_v12  ;;  %v1995_v14 = vpop.f32.mrb[14].mxu1 }
 0x2a8   : > { %2037 = vmatmul.mubr.bf16.gmra.mrb[72].mxu0 %v985_v8  ;;  %v970_v15 = vmax.f32 %v934_v11, 0.0  ;;  %v937_v16 = vadd.f32 %v1995_v14, %v2798_v37  ;;  %v928_v17 = vpop.f32.mrb[15].mxu1 }
 0x2a9   : > { %v968_v18 = vmax.f32 %v926_v13, 0.0  ;;  %v929_v19 = vadd.f32 %v2798_v37, %v928_v17  ;;  %v2836_v37 = vld [vmem:[%s3082_s6] ss:$0 sm:$0xff] }
 0x2aa   : > { %v971_v20 = vmax.f32 %v937_v16, 0.0 }
 0x2ab   : > { %v969_v21 = vmax.f32 %v929_v19, 0.0 }
 0x2ac   : > { %v987_v22 = vpack.c.bf16 %v971_v20, %v970_v15 }
 0x2ad   : > { %v986_v23 = vpack.c.bf16 %v969_v21, %v968_v18 }
 0x2af   : > { %2040 = vmatprep.mubr.bf16.mxu0 %v986_v23 }
 0x2b0   : > { %2041 = vmatmul.mubr.bf16.gmra.mrb[76].mxu0 %v987_v22 }
 0x34b   : > { %v2014_v29 = vpop.f32.mrb[48].mxu0 }
 0x34c   : > { %v1102_v30 = vadd.f32 %v2014_v29, %v2836_v37  ;;  %v1093_v2 = vpop.f32.mrb[49].mxu0 }
 0x34d   : > { %v1094_v31 = vadd.f32 %v2836_v37, %v1093_v2  ;;  %v2015_v32 = vpop.f32.mrb[50].mxu0 }
 0x34e   : > { %v1105_v33 = vadd.f32 %v2015_v32, %v2836_v37  ;;  %v1096_v34 = vpop.f32.mrb[51].mxu0  ;;  %v1222_v36 = vmax.f32 %v1102_v30, 0.0 }
 0x34f   : > { %v1097_v35 = vadd.f32 %v2836_v37, %v1096_v34  ;;  %v1220_v39 = vmax.f32 %v1094_v31, 0.0 }
 0x350   : > { %v1223_v38 = vmax.f32 %v1105_v33, 0.0 }
 0x351   : > { %v1221_v40 = vmax.f32 %v1097_v35, 0.0 }
 0x352   : > { %v1253_v41 = vpack.c.bf16 %v1223_v38, %v1222_v36 }
 0x353   : > { %v1252_v42 = vpack.c.bf16 %v1221_v40, %v1220_v39  ;;  %v2018_v43 = vpop.f32.mrb[52].mxu0 }
 0x354   : > { %v1118_v44 = vadd.f32 %v2018_v43, %v2836_v37  ;;  %v1109_v45 = vpop.f32.mrb[53].mxu0 }
 0x355   : > { %v1110_v46 = vadd.f32 %v2836_v37, %v1109_v45  ;;  %v2019_v47 = vpop.f32.mrb[54].mxu0  ;;  %1409 = vmatmul.mubr.bf16.vlgmr.msra.gmra.mrb[16].mxu1 %v1252_v42 }
 0x356   : > { %v1121_v48 = vadd.f32 %v2019_v47, %v2836_v37  ;;  %v1112_v49 = vpop.f32.mrb[55].mxu0  ;;  %1418 = vmatprep.mubr.bf16.mxu1 %v2429_v28  ;;  %v1226_v51 = vmax.f32 %v1118_v44, 0.0 }
 0x357   : > { %v1113_v50 = vadd.f32 %v2836_v37, %v1112_v49  ;;  %v1224_v53 = vmax.f32 %v1110_v46, 0.0 }
 0x358   : > { %v1227_v52 = vmax.f32 %v1121_v48, 0.0 }
 0x359   : > { %v1225_v54 = vmax.f32 %v1113_v50, 0.0 }
 0x35a   : > { %v1255_v55 = vpack.c.bf16 %v1227_v52, %v1226_v51 }
 0x35b   : > { %v1254_v56 = vpack.c.bf16 %v1225_v54, %v1224_v53  ;;  %v2022_v57 = vpop.f32.mrb[56].mxu0 }
 0x35c   : > { %v1134_v58 = vadd.f32 %v2022_v57, %v2836_v37  ;;  %v1125_v59 = vpop.f32.mrb[57].mxu0 }
 0x35d   : > { %1419 = vmatmul.mubr.bf16.gmra.mrb[20].mxu1 %v1253_v41  ;;  %v1126_v60 = vadd.f32 %v2836_v37, %v1125_v59  ;;  %v2023_v61 = vpop.f32.mrb[58].mxu0 }
 0x35e   : > { %v1230_v62 = vmax.f32 %v1134_v58, 0.0  ;;  %v1137_v63 = vadd.f32 %v2023_v61, %v2836_v37  ;;  %v1128_v0 = vpop.f32.mrb[59].mxu0  ;;  %1428 = vmatprep.mubr.bf16.mxu1 %v2429_v28 }
 0x35f   : > { %v1228_v1 = vmax.f32 %v1126_v60, 0.0  ;;  %v1129_v3 = vadd.f32 %v2836_v37, %v1128_v0 }
 0x360   : > { %v1231_v4 = vmax.f32 %v1137_v63, 0.0 }
 0x361   : > { %v1229_v5 = vmax.f32 %v1129_v3, 0.0 }
 0x362   : > { %v1257_v6 = vpack.c.bf16 %v1231_v4, %v1230_v62 }
 0x363   : > { %v1256_v7 = vpack.c.bf16 %v1229_v5, %v1228_v1  ;;  %v2026_v8 = vpop.f32.mrb[60].mxu0 }
 0x364   : > { %v1150_v9 = vadd.f32 %v2026_v8, %v2836_v37  ;;  %v1141_v10 = vpop.f32.mrb[61].mxu0 }
 0x365   : > { %1429 = vmatmul.mubr.bf16.gmra.mrb[24].mxu1 %v1254_v56  ;;  %v1142_v11 = vadd.f32 %v2836_v37, %v1141_v10  ;;  %v2027_v12 = vpop.f32.mrb[62].mxu0 }
 0x366   : > { %1438 = vmatprep.mubr.bf16.mxu1 %v2429_v28  ;;  %v1234_v13 = vmax.f32 %v1150_v9, 0.0  ;;  %v1153_v14 = vadd.f32 %v2027_v12, %v2836_v37  ;;  %v1144_v15 = vpop.f32.mrb[63].mxu0 }
 0x367   : > { %v1232_v16 = vmax.f32 %v1142_v11, 0.0  ;;  %v1145_v17 = vadd.f32 %v2836_v37, %v1144_v15 }
 0x368   : > { %v1235_v18 = vmax.f32 %v1153_v14, 0.0 }
 0x369   : > { %v1233_v19 = vmax.f32 %v1145_v17, 0.0 }
 0x36a   : > { %v2857_v20 = vpack.c.bf16 %v1235_v18, %v1234_v13  ;;  %v1284_v18 = vld [vmem:[%s3084_s8] sm:$0x3] }
 0x36b   : > { %v1258_v21 = vpack.c.bf16 %v1233_v19, %v1232_v16  ;;  %v2030_v22 = vpop.f32.mrb[64].mxu0 }
 0x36c   : > { %v1166_v23 = vadd.f32 %v2030_v22, %v2836_v37  ;;  %v1157_v24 = vpop.f32.mrb[65].mxu0 }
 0x36d   : > { %1439 = vmatmul.mubr.bf16.gmra.mrb[28].mxu1 %v1255_v55  ;;  %v1158_v25 = vadd.f32 %v2836_v37, %v1157_v24  ;;  %v2031_v26 = vpop.f32.mrb[66].mxu0 }
 0x36e   : > { %1448 = vmatprep.mubr.bf16.mxu1 %v2429_v28  ;;  %v1238_v27 = vmax.f32 %v1166_v23, 0.0  ;;  %v1169_v29 = vadd.f32 %v2031_v26, %v2836_v37  ;;  %v1160_v30 = vpop.f32.mrb[67].mxu0 }
 0x36f   : > { %v1236_v2 = vmax.f32 %v1158_v25, 0.0  ;;  %v1161_v31 = vadd.f32 %v2836_v37, %v1160_v30 }
 0x370   : > { %v1239_v32 = vmax.f32 %v1169_v29, 0.0 }
 0x371   : > { %v1237_v33 = vmax.f32 %v1161_v31, 0.0 }
 0x372   : > { %v1261_v34 = vpack.c.bf16 %v1239_v32, %v1238_v27 }
 0x373   : > { %v1260_v35 = vpack.c.bf16 %v1237_v33, %v1236_v2  ;;  %v2034_v36 = vpop.f32.mrb[68].mxu0 }
 0x374   : > { %v1182_v38 = vadd.f32 %v2034_v36, %v2836_v37  ;;  %v1173_v39 = vpop.f32.mrb[69].mxu0 }
 0x375   : > { %1449 = vmatmul.mubr.bf16.gmra.mrb[32].mxu1 %v1256_v7  ;;  %v1174_v40 = vadd.f32 %v2836_v37, %v1173_v39  ;;  %v2035_v41 = vpop.f32.mrb[70].mxu0 }
 0x376   : > { %1458 = vmatprep.mubr.bf16.mxu1 %v2429_v28  ;;  %v1242_v42 = vmax.f32 %v1182_v38, 0.0  ;;  %v1185_v43 = vadd.f32 %v2035_v41, %v2836_v37  ;;  %v1176_v44 = vpop.f32.mrb[71].mxu0 }
 0x377   : > { %v1240_v45 = vmax.f32 %v1174_v40, 0.0  ;;  %v1177_v46 = vadd.f32 %v2836_v37, %v1176_v44 }
 0x378   : > { %v1243_v47 = vmax.f32 %v1185_v43, 0.0 }
 0x379   : > { %v1241_v48 = vmax.f32 %v1177_v46, 0.0 }
 0x37a   : > { %v1263_v49 = vpack.c.bf16 %v1243_v47, %v1242_v42 }
 0x37b   : > { %v1262_v50 = vpack.c.bf16 %v1241_v48, %v1240_v45  ;;  %v2038_v51 = vpop.f32.mrb[72].mxu0 }
 0x37c   : > { %v1198_v52 = vadd.f32 %v2038_v51, %v2836_v37  ;;  %v1189_v53 = vpop.f32.mrb[73].mxu0 }
 0x37d   : > { %1459 = vmatmul.mubr.bf16.gmra.mrb[36].mxu1 %v1257_v6  ;;  %v1190_v54 = vadd.f32 %v2836_v37, %v1189_v53  ;;  %v2039_v55 = vpop.f32.mrb[74].mxu0 }
 0x37e   : > { %1468 = vmatprep.mubr.bf16.mxu1 %v2429_v28  ;;  %v1246_v56 = vmax.f32 %v1198_v52, 0.0  ;;  %v1201_v57 = vadd.f32 %v2039_v55, %v2836_v37  ;;  %v1192_v58 = vpop.f32.mrb[75].mxu0 }
 0x37f   : > { %v1244_v59 = vmax.f32 %v1190_v54, 0.0  ;;  %v1193_v60 = vadd.f32 %v2836_v37, %v1192_v58 }
 0x380   : > { %v1247_v61 = vmax.f32 %v1201_v57, 0.0 }
 0x381   : > { %v1245_v62 = vmax.f32 %v1193_v60, 0.0 }
 0x382   : > { %v1265_v63 = vpack.c.bf16 %v1247_v61, %v1246_v56 }
 0x383   : > { %v1264_v0 = vpack.c.bf16 %v1245_v62, %v1244_v59  ;;  %v2042_v1 = vpop.f32.mrb[76].mxu0 }
 0x384   : > { %v1214_v3 = vadd.f32 %v2042_v1, %v2836_v37  ;;  %v1205_v4 = vpop.f32.mrb[77].mxu0 }
 0x385   : > { %1469 = vmatmul.mubr.bf16.gmra.mrb[40].mxu1 %v1258_v21  ;;  %v1206_v5 = vadd.f32 %v2836_v37, %v1205_v4  ;;  %v2043_v6 = vpop.f32.mrb[78].mxu0 }
 0x386   : > { %1478 = vmatprep.mubr.bf16.mxu1 %v2429_v28  ;;  %v1250_v7 = vmax.f32 %v1214_v3, 0.0  ;;  %v1217_v8 = vadd.f32 %v2043_v6, %v2836_v37  ;;  %v1208_v9 = vpop.f32.mrb[79].mxu0 }
 0x387   : > { %v1248_v10 = vmax.f32 %v1206_v5, 0.0  ;;  %v1209_v11 = vadd.f32 %v2836_v37, %v1208_v9  ;;  %v1286_v37 = vlaneseq }
 0x388   : > { %v1251_v12 = vmax.f32 %v1217_v8, 0.0 }
 0x389   : > { %v1249_v13 = vmax.f32 %v1209_v11, 0.0  ;;  %v1287_v16 = vshrl.u32 %v1286_v37, 7 }
 0x38a   : > { %v1267_v14 = vpack.c.bf16 %v1251_v12, %v1250_v7 }
 0x38b   : > { %v1266_v15 = vpack.c.bf16 %v1249_v13, %v1248_v10  ;;  %v1288_v17 = vsub.s32 0, %v1287_v16  ;;  %v1292_v19 = vsub.s32 1, %v1287_v16 }
 0x38d   : > { %1479 = vmatmul.mubr.bf16.gmra.mrb[44].mxu1 %v2857_v20  ;;  %v2892_v20 = vrot.slane %v1284_v18, %v1288_v17  ;;  %v2894_v21 = vrot.slane %v1284_v18, %v1292_v19 }
 0x38e   : > { %1488 = vmatprep.mubr.bf16.mxu1 %v2429_v28 }
 0x395   : > { %1489 = vmatmul.mubr.bf16.gmra.mrb[48].mxu1 %v1260_v35 }
 0x396   : > { %1498 = vmatprep.mubr.bf16.mxu1 %v2429_v28 }
 0x39d   : > { %1499 = vmatmul.mubr.bf16.gmra.mrb[52].mxu1 %v1261_v34 }
 0x39e   : > { %1508 = vmatprep.mubr.bf16.mxu1 %v2429_v28 }
 0x3a5   : > { %1509 = vmatmul.mubr.bf16.gmra.mrb[56].mxu1 %v1262_v50 }
 0x3a6   : > { %1518 = vmatprep.mubr.bf16.mxu1 %v2429_v28 }
 0x3ad   : > { %1519 = vmatmul.mubr.bf16.gmra.mrb[60].mxu1 %v1263_v49 }
 0x3ae   : > { %1528 = vmatprep.mubr.bf16.mxu1 %v2429_v28 }
 0x3b5   : > { %1529 = vmatmul.mubr.bf16.gmra.mrb[64].mxu1 %v1264_v0 }
 0x3b6   : > { %1538 = vmatprep.mubr.bf16.mxu1 %v2429_v28 }
 0x3bd   : > { %1539 = vmatmul.mubr.bf16.gmra.mrb[68].mxu1 %v1265_v63 }
 0x3be   : > { %1548 = vmatprep.mubr.bf16.mxu1 %v2429_v28 }
 0x3c5   : > { %1549 = vmatmul.mubr.bf16.gmra.mrb[72].mxu1 %v1266_v15 }
 0x3c6   : > { %1558 = vmatprep.mubr.bf16.mxu1 %v2429_v28 }
 0x3cd   : > { %1559 = vmatmul.mubr.bf16.gmra.mrb[76].mxu1 %v1267_v14 }
 0x428   : > { %v1410_v22 = vpop.f32.mrb[16].mxu1 }
 0x429   : > { %v1411_v23 = vadd.f32 %v1410_v22, %v2892_v20  ;;  %v1412_v24 = vpop.f32.mrb[17].mxu1 }
 0x42a   : > { %v1413_v28 = vadd.f32 %v1412_v24, %v2894_v21  ;;  %v1414_v25 = vpop.f32.mrb[18].mxu1 }
 0x42b   : > { %1569 = vst [vmem:[%s2898_s16] sm:$0xff] %v1411_v23  ;;  %v1415_v26 = vadd.f32 %v1414_v25, %v2892_v20  ;;  %v1416_v27 = vpop.f32.mrb[19].mxu1 }
 0x42c   : > { %1570 = vst [vmem:[%s2898_s16 + $0x8] sm:$0xff] %v1413_v28  ;;  %v1417_v29 = vadd.f32 %v1416_v27, %v2894_v21 }
 0x42d   : > { %1571 = vst [vmem:[%s2898_s16 + $0x10] sm:$0xff] %v1415_v26 }
 0x42e   : > { %1572 = vst [vmem:[%s2898_s16 + $0x18] sm:$0xff] %v1417_v29 }
 0x430   : > { %v1420_v30 = vpop.f32.mrb[20].mxu1 }
 0x431   : > { %v1421_v2 = vadd.f32 %v1420_v30, %v2892_v20  ;;  %v1422_v31 = vpop.f32.mrb[21].mxu1 }
 0x432   : > { %v1423_v32 = vadd.f32 %v1422_v31, %v2894_v21  ;;  %v1424_v33 = vpop.f32.mrb[22].mxu1 }
 0x433   : > { %1573 = vst [vmem:[%s2898_s16 + $0x20] sm:$0xff] %v1421_v2  ;;  %v1425_v34 = vadd.f32 %v1424_v33, %v2892_v20  ;;  %v1426_v35 = vpop.f32.mrb[23].mxu1 }
 0x434   : > { %1574 = vst [vmem:[%s2898_s16 + $0x28] sm:$0xff] %v1423_v32  ;;  %v1427_v36 = vadd.f32 %v1426_v35, %v2894_v21 }
 0x435   : > { %1575 = vst [vmem:[%s2898_s16 + $0x30] sm:$0xff] %v1425_v34 }
 0x436   : > { %1576 = vst [vmem:[%s2898_s16 + $0x38] sm:$0xff] %v1427_v36 }
 0x438   : > { %v1430_v38 = vpop.f32.mrb[24].mxu1 }
 0x439   : > { %v1431_v39 = vadd.f32 %v1430_v38, %v2892_v20  ;;  %v1432_v40 = vpop.f32.mrb[25].mxu1 }
 0x43a   : > { %v1433_v41 = vadd.f32 %v1432_v40, %v2894_v21  ;;  %v1434_v42 = vpop.f32.mrb[26].mxu1 }
 0x43b   : > { %1577 = vst [vmem:[%s2898_s16 + $0x40] sm:$0xff] %v1431_v39  ;;  %v1435_v43 = vadd.f32 %v1434_v42, %v2892_v20  ;;  %v1436_v44 = vpop.f32.mrb[27].mxu1 }
 0x43c   : > { %1578 = vst [vmem:[%s2898_s16 + $0x48] sm:$0xff] %v1433_v41  ;;  %v1437_v45 = vadd.f32 %v1436_v44, %v2894_v21 }
 0x43d   : > { %1579 = vst [vmem:[%s2898_s16 + $0x50] sm:$0xff] %v1435_v43 }
 0x43e   : > { %1580 = vst [vmem:[%s2898_s16 + $0x58] sm:$0xff] %v1437_v45 }
 0x440   : > { %v1440_v46 = vpop.f32.mrb[28].mxu1 }
 0x441   : > { %v1441_v47 = vadd.f32 %v1440_v46, %v2892_v20  ;;  %v1442_v48 = vpop.f32.mrb[29].mxu1 }
 0x442   : > { %v1443_v49 = vadd.f32 %v1442_v48, %v2894_v21  ;;  %v1444_v50 = vpop.f32.mrb[30].mxu1 }
 0x443   : > { %1581 = vst [vmem:[%s2898_s16 + $0x60] sm:$0xff] %v1441_v47  ;;  %v1445_v51 = vadd.f32 %v1444_v50, %v2892_v20  ;;  %v1446_v52 = vpop.f32.mrb[31].mxu1 }
 0x444   : > { %1582 = vst [vmem:[%s2898_s16 + $0x68] sm:$0xff] %v1443_v49  ;;  %v1447_v53 = vadd.f32 %v1446_v52, %v2894_v21 }
 0x445   : > { %1583 = vst [vmem:[%s2898_s16 + $0x70] sm:$0xff] %v1445_v51 }
 0x446   : > { %1584 = vst [vmem:[%s2898_s16 + $0x78] sm:$0xff] %v1447_v53 }
 0x448   : > { %v1450_v54 = vpop.f32.mrb[32].mxu1 }
 0x449   : > { %v1451_v55 = vadd.f32 %v1450_v54, %v2892_v20  ;;  %v1452_v56 = vpop.f32.mrb[33].mxu1 }
 0x44a   : > { %v1453_v57 = vadd.f32 %v1452_v56, %v2894_v21  ;;  %v1454_v58 = vpop.f32.mrb[34].mxu1 }
 0x44b   : > { %1585 = vst [vmem:[%s2898_s16 + $0x80] sm:$0xff] %v1451_v55  ;;  %v1455_v59 = vadd.f32 %v1454_v58, %v2892_v20  ;;  %v1456_v60 = vpop.f32.mrb[35].mxu1 }
 0x44c   : > { %1586 = vst [vmem:[%s2898_s16 + $0x88] sm:$0xff] %v1453_v57  ;;  %v1457_v61 = vadd.f32 %v1456_v60, %v2894_v21 }
 0x44d   : > { %1587 = vst [vmem:[%s2898_s16 + $0x90] sm:$0xff] %v1455_v59 }
 0x44e   : > { %1588 = vst [vmem:[%s2898_s16 + $0x98] sm:$0xff] %v1457_v61 }
 0x450   : > { %v1460_v62 = vpop.f32.mrb[36].mxu1 }
 0x451   : > { %v1461_v63 = vadd.f32 %v1460_v62, %v2892_v20  ;;  %v1462_v0 = vpop.f32.mrb[37].mxu1 }
 0x452   : > { %v1463_v1 = vadd.f32 %v1462_v0, %v2894_v21  ;;  %v1464_v3 = vpop.f32.mrb[38].mxu1 }
 0x453   : > { %1589 = vst [vmem:[%s2898_s16 + $0xa0] sm:$0xff] %v1461_v63  ;;  %v1465_v4 = vadd.f32 %v1464_v3, %v2892_v20  ;;  %v1466_v5 = vpop.f32.mrb[39].mxu1 }
 0x454   : > { %1590 = vst [vmem:[%s2898_s16 + $0xa8] sm:$0xff] %v1463_v1  ;;  %v1467_v6 = vadd.f32 %v1466_v5, %v2894_v21 }
 0x455   : > { %1591 = vst [vmem:[%s2898_s16 + $0xb0] sm:$0xff] %v1465_v4 }
 0x456   : > { %1592 = vst [vmem:[%s2898_s16 + $0xb8] sm:$0xff] %v1467_v6 }
 0x458   : > { %v1470_v7 = vpop.f32.mrb[40].mxu1 }
 0x459   : > { %v1471_v8 = vadd.f32 %v1470_v7, %v2892_v20  ;;  %v1472_v9 = vpop.f32.mrb[41].mxu1 }
 0x45a   : > { %v1473_v10 = vadd.f32 %v1472_v9, %v2894_v21  ;;  %v1474_v11 = vpop.f32.mrb[42].mxu1 }
 0x45b   : > { %1593 = vst [vmem:[%s2898_s16 + $0xc0] sm:$0xff] %v1471_v8  ;;  %v1475_v12 = vadd.f32 %v1474_v11, %v2892_v20  ;;  %v1476_v13 = vpop.f32.mrb[43].mxu1 }
 0x45c   : > { %1594 = vst [vmem:[%s2898_s16 + $0xc8] sm:$0xff] %v1473_v10  ;;  %v1477_v14 = vadd.f32 %v1476_v13, %v2894_v21 }
 0x45d   : > { %1595 = vst [vmem:[%s2898_s16 + $0xd0] sm:$0xff] %v1475_v12 }
 0x45e   : > { %1596 = vst [vmem:[%s2898_s16 + $0xd8] sm:$0xff] %v1477_v14 }
 0x460   : > { %v1480_v15 = vpop.f32.mrb[44].mxu1 }
 0x461   : > { %v1481_v37 = vadd.f32 %v1480_v15, %v2892_v20  ;;  %v1482_v16 = vpop.f32.mrb[45].mxu1 }
 0x462   : > { %v1483_v17 = vadd.f32 %v1482_v16, %v2894_v21  ;;  %v1484_v18 = vpop.f32.mrb[46].mxu1 }
 0x463   : > { %1597 = vst [vmem:[%s2898_s16 + $0xe0] sm:$0xff] %v1481_v37  ;;  %v1485_v19 = vadd.f32 %v1484_v18, %v2892_v20  ;;  %v1486_v22 = vpop.f32.mrb[47].mxu1 }
 0x464   : > { %1598 = vst [vmem:[%s2898_s16 + $0xe8] sm:$0xff] %v1483_v17  ;;  %v1487_v23 = vadd.f32 %v1486_v22, %v2894_v21 }
 0x465   : > { %1599 = vst [vmem:[%s2898_s16 + $0xf0] sm:$0xff] %v1485_v19 }
 0x466   : > { %1600 = vst [vmem:[%s2898_s16 + $0xf8] sm:$0xff] %v1487_v23 }
 0x468   : > { %v1490_v24 = vpop.f32.mrb[48].mxu1 }
 0x469   : > { %v1491_v28 = vadd.f32 %v1490_v24, %v2892_v20  ;;  %v1492_v25 = vpop.f32.mrb[49].mxu1 }
 0x46a   : > { %v1493_v26 = vadd.f32 %v1492_v25, %v2894_v21  ;;  %v1494_v27 = vpop.f32.mrb[50].mxu1 }
 0x46b   : > { %1601 = vst [vmem:[%s2898_s16 + $0x100] sm:$0xff] %v1491_v28  ;;  %v1495_v29 = vadd.f32 %v1494_v27, %v2892_v20  ;;  %v1496_v30 = vpop.f32.mrb[51].mxu1 }
 0x46c   : > { %1602 = vst [vmem:[%s2898_s16 + $0x108] sm:$0xff] %v1493_v26  ;;  %v1497_v2 = vadd.f32 %v1496_v30, %v2894_v21 }
 0x46d   : > { %1603 = vst [vmem:[%s2898_s16 + $0x110] sm:$0xff] %v1495_v29 }
 0x46e   : > { %1604 = vst [vmem:[%s2898_s16 + $0x118] sm:$0xff] %v1497_v2 }
 0x470   : > { %v1500_v31 = vpop.f32.mrb[52].mxu1 }
 0x471   : > { %v1501_v32 = vadd.f32 %v1500_v31, %v2892_v20  ;;  %v1502_v33 = vpop.f32.mrb[53].mxu1 }
 0x472   : > { %v1503_v34 = vadd.f32 %v1502_v33, %v2894_v21  ;;  %v1504_v35 = vpop.f32.mrb[54].mxu1 }
 0x473   : > { %1605 = vst [vmem:[%s2898_s16 + $0x120] sm:$0xff] %v1501_v32  ;;  %v1505_v36 = vadd.f32 %v1504_v35, %v2892_v20  ;;  %v1506_v38 = vpop.f32.mrb[55].mxu1 }
 0x474   : > { %1606 = vst [vmem:[%s2898_s16 + $0x128] sm:$0xff] %v1503_v34  ;;  %v1507_v39 = vadd.f32 %v1506_v38, %v2894_v21 }
 0x475   : > { %1607 = vst [vmem:[%s2898_s16 + $0x130] sm:$0xff] %v1505_v36 }
 0x476   : > { %1608 = vst [vmem:[%s2898_s16 + $0x138] sm:$0xff] %v1507_v39 }
 0x478   : > { %v1510_v40 = vpop.f32.mrb[56].mxu1 }
 0x479   : > { %v1511_v41 = vadd.f32 %v1510_v40, %v2892_v20  ;;  %v1512_v42 = vpop.f32.mrb[57].mxu1 }
 0x47a   : > { %v1513_v43 = vadd.f32 %v1512_v42, %v2894_v21  ;;  %v1514_v44 = vpop.f32.mrb[58].mxu1 }
 0x47b   : > { %1609 = vst [vmem:[%s2898_s16 + $0x140] sm:$0xff] %v1511_v41  ;;  %v1515_v45 = vadd.f32 %v1514_v44, %v2892_v20  ;;  %v1516_v46 = vpop.f32.mrb[59].mxu1 }
 0x47c   : > { %1610 = vst [vmem:[%s2898_s16 + $0x148] sm:$0xff] %v1513_v43  ;;  %v1517_v47 = vadd.f32 %v1516_v46, %v2894_v21 }
 0x47d   : > { %1611 = vst [vmem:[%s2898_s16 + $0x150] sm:$0xff] %v1515_v45 }
 0x47e   : > { %1612 = vst [vmem:[%s2898_s16 + $0x158] sm:$0xff] %v1517_v47 }
 0x480   : > { %v1520_v48 = vpop.f32.mrb[60].mxu1 }
 0x481   : > { %v1521_v49 = vadd.f32 %v1520_v48, %v2892_v20  ;;  %v1522_v50 = vpop.f32.mrb[61].mxu1 }
 0x482   : > { %v1523_v51 = vadd.f32 %v1522_v50, %v2894_v21  ;;  %v1524_v52 = vpop.f32.mrb[62].mxu1 }
 0x483   : > { %1613 = vst [vmem:[%s2898_s16 + $0x160] sm:$0xff] %v1521_v49  ;;  %v1525_v53 = vadd.f32 %v1524_v52, %v2892_v20  ;;  %v1526_v54 = vpop.f32.mrb[63].mxu1 }
 0x484   : > { %1614 = vst [vmem:[%s2898_s16 + $0x168] sm:$0xff] %v1523_v51  ;;  %v1527_v55 = vadd.f32 %v1526_v54, %v2894_v21 }
 0x485   : > { %1615 = vst [vmem:[%s2898_s16 + $0x170] sm:$0xff] %v1525_v53 }
 0x486   : > { %1616 = vst [vmem:[%s2898_s16 + $0x178] sm:$0xff] %v1527_v55 }
 0x488   : > { %v1530_v56 = vpop.f32.mrb[64].mxu1 }
 0x489   : > { %v1531_v57 = vadd.f32 %v1530_v56, %v2892_v20  ;;  %v1532_v58 = vpop.f32.mrb[65].mxu1 }
 0x48a   : > { %v1533_v59 = vadd.f32 %v1532_v58, %v2894_v21  ;;  %v1534_v60 = vpop.f32.mrb[66].mxu1 }
 0x48b   : > { %1617 = vst [vmem:[%s2898_s16 + $0x180] sm:$0xff] %v1531_v57  ;;  %v1535_v61 = vadd.f32 %v1534_v60, %v2892_v20  ;;  %v1536_v62 = vpop.f32.mrb[67].mxu1 }
 0x48c   : > { %1618 = vst [vmem:[%s2898_s16 + $0x188] sm:$0xff] %v1533_v59  ;;  %v1537_v63 = vadd.f32 %v1536_v62, %v2894_v21 }
 0x48d   : > { %1619 = vst [vmem:[%s2898_s16 + $0x190] sm:$0xff] %v1535_v61 }
 0x48e   : > { %1620 = vst [vmem:[%s2898_s16 + $0x198] sm:$0xff] %v1537_v63 }
 0x490   : > { %v1540_v0 = vpop.f32.mrb[68].mxu1 }
 0x491   : > { %v1541_v1 = vadd.f32 %v1540_v0, %v2892_v20  ;;  %v1542_v3 = vpop.f32.mrb[69].mxu1 }
 0x492   : > { %v1543_v4 = vadd.f32 %v1542_v3, %v2894_v21  ;;  %v1544_v5 = vpop.f32.mrb[70].mxu1 }
 0x493   : > { %1621 = vst [vmem:[%s2898_s16 + $0x1a0] sm:$0xff] %v1541_v1  ;;  %v1545_v6 = vadd.f32 %v1544_v5, %v2892_v20  ;;  %v1546_v7 = vpop.f32.mrb[71].mxu1 }
 0x494   : > { %1622 = vst [vmem:[%s2898_s16 + $0x1a8] sm:$0xff] %v1543_v4  ;;  %v1547_v8 = vadd.f32 %v1546_v7, %v2894_v21 }
 0x495   : > { %1623 = vst [vmem:[%s2898_s16 + $0x1b0] sm:$0xff] %v1545_v6 }
 0x496   : > { %1624 = vst [vmem:[%s2898_s16 + $0x1b8] sm:$0xff] %v1547_v8 }
 0x498   : > { %v1550_v9 = vpop.f32.mrb[72].mxu1 }
 0x499   : > { %v1551_v10 = vadd.f32 %v1550_v9, %v2892_v20  ;;  %v1552_v11 = vpop.f32.mrb[73].mxu1 }
 0x49a   : > { %v1553_v12 = vadd.f32 %v1552_v11, %v2894_v21  ;;  %v1554_v13 = vpop.f32.mrb[74].mxu1 }
 0x49b   : > { %1625 = vst [vmem:[%s2898_s16 + $0x1c0] sm:$0xff] %v1551_v10  ;;  %v1555_v14 = vadd.f32 %v1554_v13, %v2892_v20  ;;  %v1556_v15 = vpop.f32.mrb[75].mxu1 }
 0x49c   : > { %1626 = vst [vmem:[%s2898_s16 + $0x1c8] sm:$0xff] %v1553_v12  ;;  %v1557_v37 = vadd.f32 %v1556_v15, %v2894_v21 }
 0x49d   : > { %1627 = vst [vmem:[%s2898_s16 + $0x1d0] sm:$0xff] %v1555_v14 }
 0x49e   : > { %1628 = vst [vmem:[%s2898_s16 + $0x1d8] sm:$0xff] %v1557_v37 }
 0x4a0   : > { %v1560_v16 = vpop.f32.mrb[76].mxu1 }
 0x4a1   : > { %v1561_v17 = vadd.f32 %v1560_v16, %v2892_v20  ;;  %v1562_v18 = vpop.f32.mrb[77].mxu1 }
 0x4a2   : > { %v1563_v19 = vadd.f32 %v1562_v18, %v2894_v21  ;;  %v1564_v22 = vpop.f32.mrb[78].mxu1 }
 0x4a3   : > { %1629 = vst [vmem:[%s2898_s16 + $0x1e0] sm:$0xff] %v1561_v17  ;;  %v1565_v23 = vadd.f32 %v1564_v22, %v2892_v20  ;;  %v1566_v24 = vpop.f32.mrb[79].mxu1 }
 0x4a4   : > { %1630 = vst [vmem:[%s2898_s16 + $0x1e8] sm:$0xff] %v1563_v19  ;;  %v1567_v28 = vadd.f32 %v1566_v24, %v2894_v21 }
 0x4a5   : > { %1631 = vst [vmem:[%s2898_s16 + $0x1f0] sm:$0xff] %v1565_v23 }
 0x4a6   : > { %1632 = vst [vmem:[%s2898_s16 + $0x1f8] sm:$0xff] %v1567_v28 }
 0x4a7   : > { %2357 = shalt.err (!%p2354_p12)
}
 0x4a8   : > { %s2358_s22 = scalar_lea.hbm %s3027_s17, 8192  ;;  %s2362_s16 = scalar_lea.hbm %s3109_s15, 32768 }
 0x4a9   : > { %p2359_p9 = scmp.ne.s32.totalorder %s3027_s17, %s2358_s22  ;;  %p2363_p4 = scmp.lt.u32.totalorder %s3027_s17, %s3109_s15 }
 0x4aa   : > { %p2364_p8 = scmp.lt.u32.totalorder %s2362_s16, %s2358_s22  ;;  %p2366_p0 = scmp.lt.u32.totalorder %s2358_s22, %s3027_s17 }
 0x4ab   : > { %p2360_p13 = pnand %p2359_p9, %p2656_p3 }
 0x4ac   : > { %p2365_p6 = por %p2364_p8, %p2363_p4 }
 0x4ad   : > { %p2361_p10 = pneg %p2360_p13 }
 0x4ae   : > { %p2367_p5 = por %p2366_p0, %p2365_p6 }
 0x4b0   : > { %p2368_p7 = pnand %p2367_p5, %p2361_p10 }
 0x4b2   : > { %2371 = shalt.err (!%p2368_p7)
}
 0x4b3   : > { %s2431_s29 = smov 256   ;;  %s2432_s25 = smov 16  }
 0x4b4   : > { %2078 = dma.vmem_to_hbm [thread:$0]  (%p2656_p3), %s3029_s21, 8192, %s3027_s17, %s1634_s13, %s2431_s29, %s2431_s29, %s2432_s25  }
 0x4b5 PF: > { %s3110_s14 = sld [smem:[#allocation16_spill]]  ;;  %s3111_s19 = sld [smem:[#allocation17_spill]] }
 0x4b6   : > { %p2110_p11 = scmp.ge.s32.totalorder %s2418_s12, 2 }
 0x4bb   : > { %s1663_s26 = sand.u32 1, %s3110_s14   ;;  %p3112_p1 = scmp.ne.s32.totalorder %s3111_s19, 0 }
 0x4bc   : > { %s1664_s22 = scalar_lea.sflag [#allocation4], %s1663_s26 }
 0x4bd   : > { %p2098_p2 = pnand %p2110_p11, %p3112_p1 }
 0x4bf   : > { %2401 = dma.done.wait (!%p2098_p2), %s1664_s22, 8192  }
 0x4c0   : > { %2403 = vsyncadd (!%p2098_p2), %s1664_s22, 4294959104  ;;  %p24_p12 = scmp.ge.s32.totalorder %s2643_s9, 6   ;;  %s3113_s30 = smov %s2410_s10 }
 0x4c1   : > { %s3114_s10 = smov %s2414_s11  ;;  %s3115_s11 = smov %s2652_s28 }
 0x4c2   : > { %s3116_s12 = smov %s2643_s9  ;;  %26 = sbr.rel (!%p24_p12) target bundleno = 9 (0x9), region = 117 }
 0x4c9   :  { %1669 = vsyncpa [#allocation3], 1 }
 0x4ca   :  { %1671 = vsyncpa [#allocation3 + $0x1], 1 }
 0x4cb   :  { %1672 = vsyncpa [#allocation6], 1 }
 0x4cc   :  { %1673 = vsyncpa [#allocation9], 1 }
 0x4cd   :  { %1674 = vsyncpa [#allocation4], 1 }
 0x4ce   :  { %1676 = vsyncpa [#allocation4 + $0x1], 1 }

</bundles_post_ra>
